<compile_context>
chip_gen: v7x
topology: tpu7x:2x2x1
jax: 0.10.0
libtpu: 0.0.40
codegen_flags: <defaults>
</compile_context>

<pallas_src>
import jax
import jax.numpy as jnp
from jax.experimental import pallas as pl
from jax.experimental.pallas import tpu as pltpu

EPS = 1e-6  # models_mae_swin uses partial(nn.LayerNorm, eps=1e-6)


def _patch_merge_kernel(x_ref, w_ref, b_ref, out_ref):
    """LayerNorm (affine pre-folded into weights) + 2x2/stride-2 conv.

    x_ref:   (T, 2, Wo, 2C)  raw tokens; [j, kh, ow, kw*C + c]
    w_ref:   (4C, E)         conv weight, (kh, kw, c)-major, gamma pre-folded
    b_ref:   (1, E)          conv bias with beta contribution pre-folded
    out_ref: (T, Wo, E)
    """
    T = out_ref.shape[0]
    C = x_ref.shape[3] // 2
    w = w_ref[...].astype(jnp.float32)
    bias = b_ref[...].astype(jnp.float32)
    for j in range(T):                           # static unroll over output rows
        chunk = x_ref[j].astype(jnp.float32)     # (2, Wo, 2C)
        parts = []
        for kh in range(2):
            row = chunk[kh]                      # (Wo, 2C)
            for kw in range(2):
                g = row[:, kw * C:(kw + 1) * C]  # (Wo, C) = token (2oh+kh, 2ow+kw)
                mu = jnp.mean(g, axis=-1, keepdims=True)
                d = g - mu
                var = jnp.mean(d * d, axis=-1, keepdims=True)
                parts.append(d * jax.lax.rsqrt(var + EPS))
        lhs = jnp.concatenate(parts, axis=-1)    # (Wo, 4C), ordered (kh, kw, c)
        y = jnp.dot(lhs, w, preferred_element_type=jnp.float32) + bias
        out_ref[j] = y.astype(out_ref.dtype)


def _pick_row_tile(R, Wo, max_rows=16, target_tokens=1024):
    """Largest divisor of R (so no remainder handling needed) within budget."""
    best = 1
    for d in range(1, min(R, max_rows) + 1):
        if R % d == 0 and d * Wo <= target_tokens:
            best = d
    # Keep >= 2 grid steps when possible so the parallel axis can be split
    # across the two v7x TensorCores.
    if R > 1 and R // best < 2:
        for d in range(best - 1, 0, -1):
            if R % d == 0 and R // d >= 2:
                best = d
                break
    return best


def patch_merge(x, pos_hw, gamma, beta, w, b, patch_size=2):
    """Pallas implementation of PatchMerge.forward(x, pos_hw)."""
    N, L, C = x.shape
    _, H, W, P = pos_hw.shape
    assert L == H * W
    assert patch_size == 2
    assert H % 2 == 0 and W % 2 == 0
    E = w.shape[0]
    Ho, Wo = H // 2, W // 2
    R = N * Ho                                     # output row-groups

    # --- glue: FREE reshape of x (row-major preserved, no copy) ---
    # (N, H*W, C) -> (N*Ho, 2, Wo, 2C): [r, kh, ow, kw*C + c] = x[n, (2oh+kh)*W + 2ow+kw, c]
    xv = x.reshape(R, 2, Wo, 2 * C)

    # --- fold LayerNorm affine into the conv parameters (one-time O(C*E)) ---
    w_t = w.transpose(2, 3, 1, 0)                               # (kh, kw, C, E)
    w_fold = (w_t * gamma[None, None, :, None]).reshape(4 * C, E)
    b_fold = (b + (beta[None, None, :, None] * w_t).sum(axis=(0, 1, 2))).reshape(1, E)

    t = _pick_row_tile(R, Wo)
    grid = R // t

    out = pl.pallas_call(
        _patch_merge_kernel,
        out_shape=jax.ShapeDtypeStruct((R, Wo, E), x.dtype),
        grid=(grid,),
        in_specs=[
            pl.BlockSpec((t, 2, Wo, 2 * C), lambda i: (i, 0, 0, 0)),
            pl.BlockSpec((4 * C, E), lambda i: (0, 0)),
            pl.BlockSpec((1, E), lambda i: (0, 0)),
        ],
        out_specs=pl.BlockSpec((t, Wo, E), lambda i: (i, 0, 0)),
        compiler_params=pltpu.CompilerParams(dimension_semantics=("parallel",)),
    )(xv, w_fold, b_fold)

    x_out = out.reshape(N, Ho * Wo, E)

    # pos downsample: plain JAX; XLA fuses the scale into the strided slice.
    pos_out = pos_hw[:, 0::2, 0::2, :] * 0.5

    return x_out, (Ho, Wo), pos_out


def reference(x, pos_hw, gamma, beta, w, b):
    """Pure-JAX reference mirroring the PyTorch forward (LayerNorm + Conv2d)."""
    N, L, C = x.shape
    _, H, W, _ = pos_hw.shape
    E = w.shape[0]
    mu = jnp.mean(x, axis=-1, keepdims=True)
    var = jnp.mean(jnp.square(x - mu), axis=-1, keepdims=True)
    xn = (x - mu) / jnp.sqrt(var + EPS) * gamma + beta
    xc = xn.reshape(N, H, W, C).transpose(0, 3, 1, 2)            # NCHW
    y = jax.lax.conv_general_dilated(
        xc, w, window_strides=(2, 2), padding="VALID",
        dimension_numbers=("NCHW", "OIHW", "NCHW"))
    y = y + b[None, :, None, None]
    y = y.reshape(N, E, -1).transpose(0, 2, 1)                   # (N, Lout, E)
    pos = pos_hw[:, 0::2, 0::2, :] / 2.0
    return y, (H // 2, W // 2), pos


if __name__ == "__main__":
    key = jax.random.PRNGKey(0)
    k1, k2, k3, k4, k5 = jax.random.split(key, 5)

    # small shapes: batch=2, in_chans=4, H=W=16 (L=256), embed_dim=32, patch=2
    N, C, H, W, E = 2, 4, 16, 16, 32
    L = H * W

    x = jax.random.normal(k1, (N, L, C), dtype=jnp.float32)
    hh, ww = jnp.meshgrid(jnp.arange(H, dtype=jnp.float32),
                          jnp.arange(W, dtype=jnp.float32), indexing="ij")
    pos_hw = jnp.broadcast_to(jnp.stack([hh, ww], axis=-1), (N, H, W, 2))

    # deterministic synthetic parameters (shapes from the module's __init__)
    gamma = 1.0 + 0.1 * jax.random.normal(k2, (C,), dtype=jnp.float32)
    beta = 0.1 * jax.random.normal(k3, (C,), dtype=jnp.float32)
    w = 0.05 * jax.random.normal(k4, (E, C, 2, 2), dtype=jnp.float32)  # OIHW
    b = 0.05 * jax.random.normal(k5, (E,), dtype=jnp.float32)

    x_out, (Ho, Wo), pos_out = patch_merge(x, pos_hw, gamma, beta, w, b)
    jax.block_until_ready((x_out, pos_out))

    x_ref, (Hr, Wr), pos_ref = reference(x, pos_hw, gamma, beta, w, b)
    assert (Ho, Wo) == (Hr, Wr)
    assert x_out.shape == (N, Ho * Wo, E)
    assert jnp.allclose(x_out, x_ref, atol=1e-4, rtol=1e-4)
    assert jnp.allclose(pos_out, pos_ref, atol=1e-6)
    print("KERNEL_OK")
</pallas_src>

<mosaic_0001>
module attributes {stable_mosaic.version = 11 : i64} {
  func.func @_patch_merge_kernel(%arg0: i32, %arg1: memref<8x2x8x8xf32, #tpu.memory_space<vmem>>, %arg2: memref<16x32xf32, #tpu.memory_space<vmem>>, %arg3: memref<1x32xf32, #tpu.memory_space<vmem>>, %arg4: memref<8x8x32xf32, #tpu.memory_space<vmem>>) attributes {dimension_semantics = [#tpu.dimension_semantics<parallel>], iteration_bounds = array<i64: 2>, scalar_prefetch = 0 : i64, scratch_operands = 0 : i64, tpu.core_type = #tpu.core_type<tc>, window_params = [{transform_indices = @transform_0, window_bounds = array<i64: 8, 2, 8, 8>}, {pipeline_mode = #tpu.pipeline_mode<synchronous>, transform_indices = @transform_1, window_bounds = array<i64: 16, 32>}, {pipeline_mode = #tpu.pipeline_mode<synchronous>, transform_indices = @transform_2, window_bounds = array<i64: 1, 32>}, {transform_indices = @transform_3, window_bounds = array<i64: 8, 8, 32>}]} {
    %c0 = arith.constant 0 : index
    %c0_0 = arith.constant 0 : index
    %0 = vector.load %arg2[%c0, %c0_0] : memref<16x32xf32, #tpu.memory_space<vmem>>, vector<16x32xf32>
    %c0_1 = arith.constant 0 : index
    %c0_2 = arith.constant 0 : index
    %1 = vector.load %arg3[%c0_1, %c0_2] : memref<1x32xf32, #tpu.memory_space<vmem>>, vector<1x32xf32>
    %c0_3 = arith.constant 0 : index
    %c0_4 = arith.constant 0 : index
    %c0_5 = arith.constant 0 : index
    %c0_6 = arith.constant 0 : index
    %2 = vector.load %arg1[%c0_3, %c0_4, %c0_5, %c0_6] : memref<8x2x8x8xf32, #tpu.memory_space<vmem>>, vector<1x2x8x8xf32>
    %3 = vector.shape_cast %2 : vector<1x2x8x8xf32> to vector<2x8x8xf32>
    %4 = vector.extract_strided_slice %3 {offsets = [0, 0, 0], sizes = [1, 8, 8], strides = [1, 1, 1]} : vector<2x8x8xf32> to vector<1x8x8xf32>
    %5 = vector.shape_cast %4 : vector<1x8x8xf32> to vector<8x8xf32>
    %6 = vector.extract_strided_slice %5 {offsets = [0, 0], sizes = [8, 4], strides = [1, 1]} : vector<8x8xf32> to vector<8x4xf32>
    %cst = arith.constant dense<0.000000e+00> : vector<8xf32>
    %7 = vector.multi_reduction <add>, %6, %cst [1] : vector<8x4xf32> to vector<8xf32>
    %8 = vector.shape_cast %7 : vector<8xf32> to vector<8x1xf32>
    %cst_7 = arith.constant 4.000000e+00 : f32
    %9 = vector.broadcast %cst_7 : f32 to vector<8x1xf32>
    %10 = arith.divf %8, %9 : vector<8x1xf32>
    %11 = vector.broadcast %10 : vector<8x1xf32> to vector<8x4xf32>
    %12 = arith.subf %6, %11 : vector<8x4xf32>
    %13 = arith.mulf %12, %12 : vector<8x4xf32>
    %cst_8 = arith.constant dense<0.000000e+00> : vector<8xf32>
    %14 = vector.multi_reduction <add>, %13, %cst_8 [1] : vector<8x4xf32> to vector<8xf32>
    %15 = vector.shape_cast %14 : vector<8xf32> to vector<8x1xf32>
    %cst_9 = arith.constant 4.000000e+00 : f32
    %16 = vector.broadcast %cst_9 : f32 to vector<8x1xf32>
    %17 = arith.divf %15, %16 : vector<8x1xf32>
    %cst_10 = arith.constant 9.99999997E-7 : f32
    %18 = vector.broadcast %cst_10 : f32 to vector<8x1xf32>
    %19 = arith.addf %17, %18 : vector<8x1xf32>
    %20 = math.rsqrt %19 : vector<8x1xf32>
    %21 = vector.broadcast %20 : vector<8x1xf32> to vector<8x4xf32>
    %22 = arith.mulf %12, %21 : vector<8x4xf32>
    %23 = vector.extract_strided_slice %5 {offsets = [0, 4], sizes = [8, 4], strides = [1, 1]} : vector<8x8xf32> to vector<8x4xf32>
    %cst_11 = arith.constant dense<0.000000e+00> : vector<8xf32>
    %24 = vector.multi_reduction <add>, %23, %cst_11 [1] : vector<8x4xf32> to vector<8xf32>
    %25 = vector.shape_cast %24 : vector<8xf32> to vector<8x1xf32>
    %cst_12 = arith.constant 4.000000e+00 : f32
    %26 = vector.broadcast %cst_12 : f32 to vector<8x1xf32>
    %27 = arith.divf %25, %26 : vector<8x1xf32>
    %28 = vector.broadcast %27 : vector<8x1xf32> to vector<8x4xf32>
    %29 = arith.subf %23, %28 : vector<8x4xf32>
    %30 = arith.mulf %29, %29 : vector<8x4xf32>
    %cst_13 = arith.constant dense<0.000000e+00> : vector<8xf32>
    %31 = vector.multi_reduction <add>, %30, %cst_13 [1] : vector<8x4xf32> to vector<8xf32>
    %32 = vector.shape_cast %31 : vector<8xf32> to vector<8x1xf32>
    %cst_14 = arith.constant 4.000000e+00 : f32
    %33 = vector.broadcast %cst_14 : f32 to vector<8x1xf32>
    %34 = arith.divf %32, %33 : vector<8x1xf32>
    %cst_15 = arith.constant 9.99999997E-7 : f32
    %35 = vector.broadcast %cst_15 : f32 to vector<8x1xf32>
    %36 = arith.addf %34, %35 : vector<8x1xf32>
    %37 = math.rsqrt %36 : vector<8x1xf32>
    %38 = vector.broadcast %37 : vector<8x1xf32> to vector<8x4xf32>
    %39 = arith.mulf %29, %38 : vector<8x4xf32>
    %40 = vector.extract_strided_slice %3 {offsets = [1, 0, 0], sizes = [1, 8, 8], strides = [1, 1, 1]} : vector<2x8x8xf32> to vector<1x8x8xf32>
    %41 = vector.shape_cast %40 : vector<1x8x8xf32> to vector<8x8xf32>
    %42 = vector.extract_strided_slice %41 {offsets = [0, 0], sizes = [8, 4], strides = [1, 1]} : vector<8x8xf32> to vector<8x4xf32>
    %cst_16 = arith.constant dense<0.000000e+00> : vector<8xf32>
    %43 = vector.multi_reduction <add>, %42, %cst_16 [1] : vector<8x4xf32> to vector<8xf32>
    %44 = vector.shape_cast %43 : vector<8xf32> to vector<8x1xf32>
    %cst_17 = arith.constant 4.000000e+00 : f32
    %45 = vector.broadcast %cst_17 : f32 to vector<8x1xf32>
    %46 = arith.divf %44, %45 : vector<8x1xf32>
    %47 = vector.broadcast %46 : vector<8x1xf32> to vector<8x4xf32>
    %48 = arith.subf %42, %47 : vector<8x4xf32>
    %49 = arith.mulf %48, %48 : vector<8x4xf32>
    %cst_18 = arith.constant dense<0.000000e+00> : vector<8xf32>
    %50 = vector.multi_reduction <add>, %49, %cst_18 [1] : vector<8x4xf32> to vector<8xf32>
    %51 = vector.shape_cast %50 : vector<8xf32> to vector<8x1xf32>
    %cst_19 = arith.constant 4.000000e+00 : f32
    %52 = vector.broadcast %cst_19 : f32 to vector<8x1xf32>
    %53 = arith.divf %51, %52 : vector<8x1xf32>
    %cst_20 = arith.constant 9.99999997E-7 : f32
    %54 = vector.broadcast %cst_20 : f32 to vector<8x1xf32>
    %55 = arith.addf %53, %54 : vector<8x1xf32>
    %56 = math.rsqrt %55 : vector<8x1xf32>
    %57 = vector.broadcast %56 : vector<8x1xf32> to vector<8x4xf32>
    %58 = arith.mulf %48, %57 : vector<8x4xf32>
    %59 = vector.extract_strided_slice %41 {offsets = [0, 4], sizes = [8, 4], strides = [1, 1]} : vector<8x8xf32> to vector<8x4xf32>
    %cst_21 = arith.constant dense<0.000000e+00> : vector<8xf32>
    %60 = vector.multi_reduction <add>, %59, %cst_21 [1] : vector<8x4xf32> to vector<8xf32>
    %61 = vector.shape_cast %60 : vector<8xf32> to vector<8x1xf32>
    %cst_22 = arith.constant 4.000000e+00 : f32
    %62 = vector.broadcast %cst_22 : f32 to vector<8x1xf32>
    %63 = arith.divf %61, %62 : vector<8x1xf32>
    %64 = vector.broadcast %63 : vector<8x1xf32> to vector<8x4xf32>
    %65 = arith.subf %59, %64 : vector<8x4xf32>
    %66 = arith.mulf %65, %65 : vector<8x4xf32>
    %cst_23 = arith.constant dense<0.000000e+00> : vector<8xf32>
    %67 = vector.multi_reduction <add>, %66, %cst_23 [1] : vector<8x4xf32> to vector<8xf32>
    %68 = vector.shape_cast %67 : vector<8xf32> to vector<8x1xf32>
    %cst_24 = arith.constant 4.000000e+00 : f32
    %69 = vector.broadcast %cst_24 : f32 to vector<8x1xf32>
    %70 = arith.divf %68, %69 : vector<8x1xf32>
    %cst_25 = arith.constant 9.99999997E-7 : f32
    %71 = vector.broadcast %cst_25 : f32 to vector<8x1xf32>
    %72 = arith.addf %70, %71 : vector<8x1xf32>
    %73 = math.rsqrt %72 : vector<8x1xf32>
    %74 = vector.broadcast %73 : vector<8x1xf32> to vector<8x4xf32>
    %75 = arith.mulf %65, %74 : vector<8x4xf32>
    %76 = tpu.concatenate %22, %39, %58, %75 in 1 : vector<8x4xf32>, vector<8x4xf32>, vector<8x4xf32>, vector<8x4xf32> -> vector<8x16xf32>
    %cst_26 = arith.constant dense<0.000000e+00> : vector<8x32xf32>
    %77 = tpu.matmul %76, %0, %cst_26 {dimension_numbers = #tpu.dot_dimension_numbers<[1], [0], [0], [1], [0, 0, 1, 1], [], []>} : vector<8x16xf32>, vector<16x32xf32>, vector<8x32xf32> -> vector<8x32xf32>
    %78 = vector.broadcast %1 : vector<1x32xf32> to vector<8x32xf32>
    %79 = arith.addf %77, %78 : vector<8x32xf32>
    %c0_27 = arith.constant 0 : index
    %c0_28 = arith.constant 0 : index
    %c0_29 = arith.constant 0 : index
    %80 = vector.load %arg4[%c0_27, %c0_28, %c0_29] : memref<8x8x32xf32, #tpu.memory_space<vmem>>, vector<1x8x32xf32>
    %81 = vector.shape_cast %80 : vector<1x8x32xf32> to vector<8x32xf32>
    %82 = vector.shape_cast %79 : vector<8x32xf32> to vector<1x8x32xf32>
    tpu.vector_store %arg4[%c0_27, %c0_28, %c0_29], %82 {strides = array<i32>} : memref<8x8x32xf32, #tpu.memory_space<vmem>>, vector<1x8x32xf32>,
    %c1 = arith.constant 1 : index
    %c0_30 = arith.constant 0 : index
    %c0_31 = arith.constant 0 : index
    %c0_32 = arith.constant 0 : index
    %83 = vector.load %arg1[%c1, %c0_30, %c0_31, %c0_32] : memref<8x2x8x8xf32, #tpu.memory_space<vmem>>, vector<1x2x8x8xf32>
    %84 = vector.shape_cast %83 : vector<1x2x8x8xf32> to vector<2x8x8xf32>
    %85 = vector.extract_strided_slice %84 {offsets = [0, 0, 0], sizes = [1, 8, 8], strides = [1, 1, 1]} : vector<2x8x8xf32> to vector<1x8x8xf32>
    %86 = vector.shape_cast %85 : vector<1x8x8xf32> to vector<8x8xf32>
    %87 = vector.extract_strided_slice %86 {offsets = [0, 0], sizes = [8, 4], strides = [1, 1]} : vector<8x8xf32> to vector<8x4xf32>
    %cst_33 = arith.constant dense<0.000000e+00> : vector<8xf32>
    %88 = vector.multi_reduction <add>, %87, %cst_33 [1] : vector<8x4xf32> to vector<8xf32>
    %89 = vector.shape_cast %88 : vector<8xf32> to vector<8x1xf32>
    %cst_34 = arith.constant 4.000000e+00 : f32
    %90 = vector.broadcast %cst_34 : f32 to vector<8x1xf32>
    %91 = arith.divf %89, %90 : vector<8x1xf32>
    %92 = vector.broadcast %91 : vector<8x1xf32> to vector<8x4xf32>
    %93 = arith.subf %87, %92 : vector<8x4xf32>
    %94 = arith.mulf %93, %93 : vector<8x4xf32>
    %cst_35 = arith.constant dense<0.000000e+00> : vector<8xf32>
    %95 = vector.multi_reduction <add>, %94, %cst_35 [1] : vector<8x4xf32> to vector<8xf32>
    %96 = vector.shape_cast %95 : vector<8xf32> to vector<8x1xf32>
    %cst_36 = arith.constant 4.000000e+00 : f32
    %97 = vector.broadcast %cst_36 : f32 to vector<8x1xf32>
    %98 = arith.divf %96, %97 : vector<8x1xf32>
    %cst_37 = arith.constant 9.99999997E-7 : f32
    %99 = vector.broadcast %cst_37 : f32 to vector<8x1xf32>
    %100 = arith.addf %98, %99 : vector<8x1xf32>
    %101 = math.rsqrt %100 : vector<8x1xf32>
    %102 = vector.broadcast %101 : vector<8x1xf32> to vector<8x4xf32>
    %103 = arith.mulf %93, %102 : vector<8x4xf32>
    %104 = vector.extract_strided_slice %86 {offsets = [0, 4], sizes = [8, 4], strides = [1, 1]} : vector<8x8xf32> to vector<8x4xf32>
    %cst_38 = arith.constant dense<0.000000e+00> : vector<8xf32>
    %105 = vector.multi_reduction <add>, %104, %cst_38 [1] : vector<8x4xf32> to vector<8xf32>
    %106 = vector.shape_cast %105 : vector<8xf32> to vector<8x1xf32>
    %cst_39 = arith.constant 4.000000e+00 : f32
    %107 = vector.broadcast %cst_39 : f32 to vector<8x1xf32>
    %108 = arith.divf %106, %107 : vector<8x1xf32>
    %109 = vector.broadcast %108 : vector<8x1xf32> to vector<8x4xf32>
    %110 = arith.subf %104, %109 : vector<8x4xf32>
    %111 = arith.mulf %110, %110 : vector<8x4xf32>
    %cst_40 = arith.constant dense<0.000000e+00> : vector<8xf32>
    %112 = vector.multi_reduction <add>, %111, %cst_40 [1] : vector<8x4xf32> to vector<8xf32>
    %113 = vector.shape_cast %112 : vector<8xf32> to vector<8x1xf32>
    %cst_41 = arith.constant 4.000000e+00 : f32
    %114 = vector.broadcast %cst_41 : f32 to vector<8x1xf32>
    %115 = arith.divf %113, %114 : vector<8x1xf32>
    %cst_42 = arith.constant 9.99999997E-7 : f32
    %116 = vector.broadcast %cst_42 : f32 to vector<8x1xf32>
    %117 = arith.addf %115, %116 : vector<8x1xf32>
    %118 = math.rsqrt %117 : vector<8x1xf32>
    %119 = vector.broadcast %118 : vector<8x1xf32> to vector<8x4xf32>
    %120 = arith.mulf %110, %119 : vector<8x4xf32>
    %121 = vector.extract_strided_slice %84 {offsets = [1, 0, 0], sizes = [1, 8, 8], strides = [1, 1, 1]} : vector<2x8x8xf32> to vector<1x8x8xf32>
    %122 = vector.shape_cast %121 : vector<1x8x8xf32> to vector<8x8xf32>
    %123 = vector.extract_strided_slice %122 {offsets = [0, 0], sizes = [8, 4], strides = [1, 1]} : vector<8x8xf32> to vector<8x4xf32>
    %cst_43 = arith.constant dense<0.000000e+00> : vector<8xf32>
    %124 = vector.multi_reduction <add>, %123, %cst_43 [1] : vector<8x4xf32> to vector<8xf32>
    %125 = vector.shape_cast %124 : vector<8xf32> to vector<8x1xf32>
    %cst_44 = arith.constant 4.000000e+00 : f32
    %126 = vector.broadcast %cst_44 : f32 to vector<8x1xf32>
    %127 = arith.divf %125, %126 : vector<8x1xf32>
    %128 = vector.broadcast %127 : vector<8x1xf32> to vector<8x4xf32>
    %129 = arith.subf %123, %128 : vector<8x4xf32>
    %130 = arith.mulf %129, %129 : vector<8x4xf32>
    %cst_45 = arith.constant dense<0.000000e+00> : vector<8xf32>
    %131 = vector.multi_reduction <add>, %130, %cst_45 [1] : vector<8x4xf32> to vector<8xf32>
    %132 = vector.shape_cast %131 : vector<8xf32> to vector<8x1xf32>
    %cst_46 = arith.constant 4.000000e+00 : f32
    %133 = vector.broadcast %cst_46 : f32 to vector<8x1xf32>
    %134 = arith.divf %132, %133 : vector<8x1xf32>
    %cst_47 = arith.constant 9.99999997E-7 : f32
    %135 = vector.broadcast %cst_47 : f32 to vector<8x1xf32>
    %136 = arith.addf %134, %135 : vector<8x1xf32>
    %137 = math.rsqrt %136 : vector<8x1xf32>
    %138 = vector.broadcast %137 : vector<8x1xf32> to vector<8x4xf32>
    %139 = arith.mulf %129, %138 : vector<8x4xf32>
    %140 = vector.extract_strided_slice %122 {offsets = [0, 4], sizes = [8, 4], strides = [1, 1]} : vector<8x8xf32> to vector<8x4xf32>
    %cst_48 = arith.constant dense<0.000000e+00> : vector<8xf32>
    %141 = vector.multi_reduction <add>, %140, %cst_48 [1] : vector<8x4xf32> to vector<8xf32>
    %142 = vector.shape_cast %141 : vector<8xf32> to vector<8x1xf32>
    %cst_49 = arith.constant 4.000000e+00 : f32
    %143 = vector.broadcast %cst_49 : f32 to vector<8x1xf32>
    %144 = arith.divf %142, %143 : vector<8x1xf32>
    %145 = vector.broadcast %144 : vector<8x1xf32> to vector<8x4xf32>
    %146 = arith.subf %140, %145 : vector<8x4xf32>
    %147 = arith.mulf %146, %146 : vector<8x4xf32>
    %cst_50 = arith.constant dense<0.000000e+00> : vector<8xf32>
    %148 = vector.multi_reduction <add>, %147, %cst_50 [1] : vector<8x4xf32> to vector<8xf32>
    %149 = vector.shape_cast %148 : vector<8xf32> to vector<8x1xf32>
    %cst_51 = arith.constant 4.000000e+00 : f32
    %150 = vector.broadcast %cst_51 : f32 to vector<8x1xf32>
    %151 = arith.divf %149, %150 : vector<8x1xf32>
    %cst_52 = arith.constant 9.99999997E-7 : f32
    %152 = vector.broadcast %cst_52 : f32 to vector<8x1xf32>
    %153 = arith.addf %151, %152 : vector<8x1xf32>
    %154 = math.rsqrt %153 : vector<8x1xf32>
    %155 = vector.broadcast %154 : vector<8x1xf32> to vector<8x4xf32>
    %156 = arith.mulf %146, %155 : vector<8x4xf32>
    %157 = tpu.concatenate %103, %120, %139, %156 in 1 : vector<8x4xf32>, vector<8x4xf32>, vector<8x4xf32>, vector<8x4xf32> -> vector<8x16xf32>
    %cst_53 = arith.constant dense<0.000000e+00> : vector<8x32xf32>
    %158 = tpu.matmul %157, %0, %cst_53 {dimension_numbers = #tpu.dot_dimension_numbers<[1], [0], [0], [1], [0, 0, 1, 1], [], []>} : vector<8x16xf32>, vector<16x32xf32>, vector<8x32xf32> -> vector<8x32xf32>
    %159 = vector.broadcast %1 : vector<1x32xf32> to vector<8x32xf32>
    %160 = arith.addf %158, %159 : vector<8x32xf32>
    %c1_54 = arith.constant 1 : index
    %c0_55 = arith.constant 0 : index
    %c0_56 = arith.constant 0 : index
    %161 = vector.load %arg4[%c1_54, %c0_55, %c0_56] : memref<8x8x32xf32, #tpu.memory_space<vmem>>, vector<1x8x32xf32>
    %162 = vector.shape_cast %161 : vector<1x8x32xf32> to vector<8x32xf32>
    %163 = vector.shape_cast %160 : vector<8x32xf32> to vector<1x8x32xf32>
    tpu.vector_store %arg4[%c1_54, %c0_55, %c0_56], %163 {strides = array<i32>} : memref<8x8x32xf32, #tpu.memory_space<vmem>>, vector<1x8x32xf32>,
    %c2 = arith.constant 2 : index
    %c0_57 = arith.constant 0 : index
    %c0_58 = arith.constant 0 : index
    %c0_59 = arith.constant 0 : index
    %164 = vector.load %arg1[%c2, %c0_57, %c0_58, %c0_59] : memref<8x2x8x8xf32, #tpu.memory_space<vmem>>, vector<1x2x8x8xf32>
    %165 = vector.shape_cast %164 : vector<1x2x8x8xf32> to vector<2x8x8xf32>
    %166 = vector.extract_strided_slice %165 {offsets = [0, 0, 0], sizes = [1, 8, 8], strides = [1, 1, 1]} : vector<2x8x8xf32> to vector<1x8x8xf32>
    %167 = vector.shape_cast %166 : vector<1x8x8xf32> to vector<8x8xf32>
    %168 = vector.extract_strided_slice %167 {offsets = [0, 0], sizes = [8, 4], strides = [1, 1]} : vector<8x8xf32> to vector<8x4xf32>
    %cst_60 = arith.constant dense<0.000000e+00> : vector<8xf32>
    %169 = vector.multi_reduction <add>, %168, %cst_60 [1] : vector<8x4xf32> to vector<8xf32>
    %170 = vector.shape_cast %169 : vector<8xf32> to vector<8x1xf32>
    %cst_61 = arith.constant 4.000000e+00 : f32
    %171 = vector.broadcast %cst_61 : f32 to vector<8x1xf32>
    %172 = arith.divf %170, %171 : vector<8x1xf32>
    %173 = vector.broadcast %172 : vector<8x1xf32> to vector<8x4xf32>
    %174 = arith.subf %168, %173 : vector<8x4xf32>
    %175 = arith.mulf %174, %174 : vector<8x4xf32>
    %cst_62 = arith.constant dense<0.000000e+00> : vector<8xf32>
    %176 = vector.multi_reduction <add>, %175, %cst_62 [1] : vector<8x4xf32> to vector<8xf32>
    %177 = vector.shape_cast %176 : vector<8xf32> to vector<8x1xf32>
    %cst_63 = arith.constant 4.000000e+00 : f32
    %178 = vector.broadcast %cst_63 : f32 to vector<8x1xf32>
    %179 = arith.divf %177, %178 : vector<8x1xf32>
    %cst_64 = arith.constant 9.99999997E-7 : f32
    %180 = vector.broadcast %cst_64 : f32 to vector<8x1xf32>
    %181 = arith.addf %179, %180 : vector<8x1xf32>
    %182 = math.rsqrt %181 : vector<8x1xf32>
    %183 = vector.broadcast %182 : vector<8x1xf32> to vector<8x4xf32>
    %184 = arith.mulf %174, %183 : vector<8x4xf32>
    %185 = vector.extract_strided_slice %167 {offsets = [0, 4], sizes = [8, 4], strides = [1, 1]} : vector<8x8xf32> to vector<8x4xf32>
    %cst_65 = arith.constant dense<0.000000e+00> : vector<8xf32>
    %186 = vector.multi_reduction <add>, %185, %cst_65 [1] : vector<8x4xf32> to vector<8xf32>
    %187 = vector.shape_cast %186 : vector<8xf32> to vector<8x1xf32>
    %cst_66 = arith.constant 4.000000e+00 : f32
    %188 = vector.broadcast %cst_66 : f32 to vector<8x1xf32>
    %189 = arith.divf %187, %188 : vector<8x1xf32>
    %190 = vector.broadcast %189 : vector<8x1xf32> to vector<8x4xf32>
    %191 = arith.subf %185, %190 : vector<8x4xf32>
    %192 = arith.mulf %191, %191 : vector<8x4xf32>
    %cst_67 = arith.constant dense<0.000000e+00> : vector<8xf32>
    %193 = vector.multi_reduction <add>, %192, %cst_67 [1] : vector<8x4xf32> to vector<8xf32>
    %194 = vector.shape_cast %193 : vector<8xf32> to vector<8x1xf32>
    %cst_68 = arith.constant 4.000000e+00 : f32
    %195 = vector.broadcast %cst_68 : f32 to vector<8x1xf32>
    %196 = arith.divf %194, %195 : vector<8x1xf32>
    %cst_69 = arith.constant 9.99999997E-7 : f32
    %197 = vector.broadcast %cst_69 : f32 to vector<8x1xf32>
    %198 = arith.addf %196, %197 : vector<8x1xf32>
    %199 = math.rsqrt %198 : vector<8x1xf32>
    %200 = vector.broadcast %199 : vector<8x1xf32> to vector<8x4xf32>
    %201 = arith.mulf %191, %200 : vector<8x4xf32>
    %202 = vector.extract_strided_slice %165 {offsets = [1, 0, 0], sizes = [1, 8, 8], strides = [1, 1, 1]} : vector<2x8x8xf32> to vector<1x8x8xf32>
    %203 = vector.shape_cast %202 : vector<1x8x8xf32> to vector<8x8xf32>
    %204 = vector.extract_strided_slice %203 {offsets = [0, 0], sizes = [8, 4], strides = [1, 1]} : vector<8x8xf32> to vector<8x4xf32>
    %cst_70 = arith.constant dense<0.000000e+00> : vector<8xf32>
    %205 = vector.multi_reduction <add>, %204, %cst_70 [1] : vector<8x4xf32> to vector<8xf32>
    %206 = vector.shape_cast %205 : vector<8xf32> to vector<8x1xf32>
    %cst_71 = arith.constant 4.000000e+00 : f32
    %207 = vector.broadcast %cst_71 : f32 to vector<8x1xf32>
    %208 = arith.divf %206, %207 : vector<8x1xf32>
    %209 = vector.broadcast %208 : vector<8x1xf32> to vector<8x4xf32>
    %210 = arith.subf %204, %209 : vector<8x4xf32>
    %211 = arith.mulf %210, %210 : vector<8x4xf32>
    %cst_72 = arith.constant dense<0.000000e+00> : vector<8xf32>
    %212 = vector.multi_reduction <add>, %211, %cst_72 [1] : vector<8x4xf32> to vector<8xf32>
    %213 = vector.shape_cast %212 : vector<8xf32> to vector<8x1xf32>
    %cst_73 = arith.constant 4.000000e+00 : f32
    %214 = vector.broadcast %cst_73 : f32 to vector<8x1xf32>
    %215 = arith.divf %213, %214 : vector<8x1xf32>
    %cst_74 = arith.constant 9.99999997E-7 : f32
    %216 = vector.broadcast %cst_74 : f32 to vector<8x1xf32>
    %217 = arith.addf %215, %216 : vector<8x1xf32>
    %218 = math.rsqrt %217 : vector<8x1xf32>
    %219 = vector.broadcast %218 : vector<8x1xf32> to vector<8x4xf32>
    %220 = arith.mulf %210, %219 : vector<8x4xf32>
    %221 = vector.extract_strided_slice %203 {offsets = [0, 4], sizes = [8, 4], strides = [1, 1]} : vector<8x8xf32> to vector<8x4xf32>
    %cst_75 = arith.constant dense<0.000000e+00> : vector<8xf32>
    %222 = vector.multi_reduction <add>, %221, %cst_75 [1] : vector<8x4xf32> to vector<8xf32>
    %223 = vector.shape_cast %222 : vector<8xf32> to vector<8x1xf32>
    %cst_76 = arith.constant 4.000000e+00 : f32
    %224 = vector.broadcast %cst_76 : f32 to vector<8x1xf32>
    %225 = arith.divf %223, %224 : vector<8x1xf32>
    %226 = vector.broadcast %225 : vector<8x1xf32> to vector<8x4xf32>
    %227 = arith.subf %221, %226 : vector<8x4xf32>
    %228 = arith.mulf %227, %227 : vector<8x4xf32>
    %cst_77 = arith.constant dense<0.000000e+00> : vector<8xf32>
    %229 = vector.multi_reduction <add>, %228, %cst_77 [1] : vector<8x4xf32> to vector<8xf32>
    %230 = vector.shape_cast %229 : vector<8xf32> to vector<8x1xf32>
    %cst_78 = arith.constant 4.000000e+00 : f32
    %231 = vector.broadcast %cst_78 : f32 to vector<8x1xf32>
    %232 = arith.divf %230, %231 : vector<8x1xf32>
    %cst_79 = arith.constant 9.99999997E-7 : f32
    %233 = vector.broadcast %cst_79 : f32 to vector<8x1xf32>
    %234 = arith.addf %232, %233 : vector<8x1xf32>
    %235 = math.rsqrt %234 : vector<8x1xf32>
    %236 = vector.broadcast %235 : vector<8x1xf32> to vector<8x4xf32>
    %237 = arith.mulf %227, %236 : vector<8x4xf32>
    %238 = tpu.concatenate %184, %201, %220, %237 in 1 : vector<8x4xf32>, vector<8x4xf32>, vector<8x4xf32>, vector<8x4xf32> -> vector<8x16xf32>
    %cst_80 = arith.constant dense<0.000000e+00> : vector<8x32xf32>
    %239 = tpu.matmul %238, %0, %cst_80 {dimension_numbers = #tpu.dot_dimension_numbers<[1], [0], [0], [1], [0, 0, 1, 1], [], []>} : vector<8x16xf32>, vector<16x32xf32>, vector<8x32xf32> -> vector<8x32xf32>
    %240 = vector.broadcast %1 : vector<1x32xf32> to vector<8x32xf32>
    %241 = arith.addf %239, %240 : vector<8x32xf32>
    %c2_81 = arith.constant 2 : index
    %c0_82 = arith.constant 0 : index
    %c0_83 = arith.constant 0 : index
    %242 = vector.load %arg4[%c2_81, %c0_82, %c0_83] : memref<8x8x32xf32, #tpu.memory_space<vmem>>, vector<1x8x32xf32>
    %243 = vector.shape_cast %242 : vector<1x8x32xf32> to vector<8x32xf32>
    %244 = vector.shape_cast %241 : vector<8x32xf32> to vector<1x8x32xf32>
    tpu.vector_store %arg4[%c2_81, %c0_82, %c0_83], %244 {strides = array<i32>} : memref<8x8x32xf32, #tpu.memory_space<vmem>>, vector<1x8x32xf32>,
    %c3 = arith.constant 3 : index
    %c0_84 = arith.constant 0 : index
    %c0_85 = arith.constant 0 : index
    %c0_86 = arith.constant 0 : index
    %245 = vector.load %arg1[%c3, %c0_84, %c0_85, %c0_86] : memref<8x2x8x8xf32, #tpu.memory_space<vmem>>, vector<1x2x8x8xf32>
    %246 = vector.shape_cast %245 : vector<1x2x8x8xf32> to vector<2x8x8xf32>
    %247 = vector.extract_strided_slice %246 {offsets = [0, 0, 0], sizes = [1, 8, 8], strides = [1, 1, 1]} : vector<2x8x8xf32> to vector<1x8x8xf32>
    %248 = vector.shape_cast %247 : vector<1x8x8xf32> to vector<8x8xf32>
    %249 = vector.extract_strided_slice %248 {offsets = [0, 0], sizes = [8, 4], strides = [1, 1]} : vector<8x8xf32> to vector<8x4xf32>
    %cst_87 = arith.constant dense<0.000000e+00> : vector<8xf32>
    %250 = vector.multi_reduction <add>, %249, %cst_87 [1] : vector<8x4xf32> to vector<8xf32>
    %251 = vector.shape_cast %250 : vector<8xf32> to vector<8x1xf32>
    %cst_88 = arith.constant 4.000000e+00 : f32
    %252 = vector.broadcast %cst_88 : f32 to vector<8x1xf32>
    %253 = arith.divf %251, %252 : vector<8x1xf32>
    %254 = vector.broadcast %253 : vector<8x1xf32> to vector<8x4xf32>
    %255 = arith.subf %249, %254 : vector<8x4xf32>
    %256 = arith.mulf %255, %255 : vector<8x4xf32>
    %cst_89 = arith.constant dense<0.000000e+00> : vector<8xf32>
    %257 = vector.multi_reduction <add>, %256, %cst_89 [1] : vector<8x4xf32> to vector<8xf32>
    %258 = vector.shape_cast %257 : vector<8xf32> to vector<8x1xf32>
    %cst_90 = arith.constant 4.000000e+00 : f32
    %259 = vector.broadcast %cst_90 : f32 to vector<8x1xf32>
    %260 = arith.divf %258, %259 : vector<8x1xf32>
    %cst_91 = arith.constant 9.99999997E-7 : f32
    %261 = vector.broadcast %cst_91 : f32 to vector<8x1xf32>
    %262 = arith.addf %260, %261 : vector<8x1xf32>
    %263 = math.rsqrt %262 : vector<8x1xf32>
    %264 = vector.broadcast %263 : vector<8x1xf32> to vector<8x4xf32>
    %265 = arith.mulf %255, %264 : vector<8x4xf32>
    %266 = vector.extract_strided_slice %248 {offsets = [0, 4], sizes = [8, 4], strides = [1, 1]} : vector<8x8xf32> to vector<8x4xf32>
    %cst_92 = arith.constant dense<0.000000e+00> : vector<8xf32>
    %267 = vector.multi_reduction <add>, %266, %cst_92 [1] : vector<8x4xf32> to vector<8xf32>
    %268 = vector.shape_cast %267 : vector<8xf32> to vector<8x1xf32>
    %cst_93 = arith.constant 4.000000e+00 : f32
    %269 = vector.broadcast %cst_93 : f32 to vector<8x1xf32>
    %270 = arith.divf %268, %269 : vector<8x1xf32>
    %271 = vector.broadcast %270 : vector<8x1xf32> to vector<8x4xf32>
    %272 = arith.subf %266, %271 : vector<8x4xf32>
    %273 = arith.mulf %272, %272 : vector<8x4xf32>
    %cst_94 = arith.constant dense<0.000000e+00> : vector<8xf32>
    %274 = vector.multi_reduction <add>, %273, %cst_94 [1] : vector<8x4xf32> to vector<8xf32>
    %275 = vector.shape_cast %274 : vector<8xf32> to vector<8x1xf32>
    %cst_95 = arith.constant 4.000000e+00 : f32
    %276 = vector.broadcast %cst_95 : f32 to vector<8x1xf32>
    %277 = arith.divf %275, %276 : vector<8x1xf32>
    %cst_96 = arith.constant 9.99999997E-7 : f32
    %278 = vector.broadcast %cst_96 : f32 to vector<8x1xf32>
    %279 = arith.addf %277, %278 : vector<8x1xf32>
    %280 = math.rsqrt %279 : vector<8x1xf32>
    %281 = vector.broadcast %280 : vector<8x1xf32> to vector<8x4xf32>
    %282 = arith.mulf %272, %281 : vector<8x4xf32>
    %283 = vector.extract_strided_slice %246 {offsets = [1, 0, 0], sizes = [1, 8, 8], strides = [1, 1, 1]} : vector<2x8x8xf32> to vector<1x8x8xf32>
    %284 = vector.shape_cast %283 : vector<1x8x8xf32> to vector<8x8xf32>
    %285 = vector.extract_strided_slice %284 {offsets = [0, 0], sizes = [8, 4], strides = [1, 1]} : vector<8x8xf32> to vector<8x4xf32>
    %cst_97 = arith.constant dense<0.000000e+00> : vector<8xf32>
    %286 = vector.multi_reduction <add>, %285, %cst_97 [1] : vector<8x4xf32> to vector<8xf32>
    %287 = vector.shape_cast %286 : vector<8xf32> to vector<8x1xf32>
    %cst_98 = arith.constant 4.000000e+00 : f32
    %288 = vector.broadcast %cst_98 : f32 to vector<8x1xf32>
    %289 = arith.divf %287, %288 : vector<8x1xf32>
    %290 = vector.broadcast %289 : vector<8x1xf32> to vector<8x4xf32>
    %291 = arith.subf %285, %290 : vector<8x4xf32>
    %292 = arith.mulf %291, %291 : vector<8x4xf32>
    %cst_99 = arith.constant dense<0.000000e+00> : vector<8xf32>
    %293 = vector.multi_reduction <add>, %292, %cst_99 [1] : vector<8x4xf32> to vector<8xf32>
    %294 = vector.shape_cast %293 : vector<8xf32> to vector<8x1xf32>
    %cst_100 = arith.constant 4.000000e+00 : f32
    %295 = vector.broadcast %cst_100 : f32 to vector<8x1xf32>
    %296 = arith.divf %294, %295 : vector<8x1xf32>
    %cst_101 = arith.constant 9.99999997E-7 : f32
    %297 = vector.broadcast %cst_101 : f32 to vector<8x1xf32>
    %298 = arith.addf %296, %297 : vector<8x1xf32>
    %299 = math.rsqrt %298 : vector<8x1xf32>
    %300 = vector.broadcast %299 : vector<8x1xf32> to vector<8x4xf32>
    %301 = arith.mulf %291, %300 : vector<8x4xf32>
    %302 = vector.extract_strided_slice %284 {offsets = [0, 4], sizes = [8, 4], strides = [1, 1]} : vector<8x8xf32> to vector<8x4xf32>
    %cst_102 = arith.constant dense<0.000000e+00> : vector<8xf32>
    %303 = vector.multi_reduction <add>, %302, %cst_102 [1] : vector<8x4xf32> to vector<8xf32>
    %304 = vector.shape_cast %303 : vector<8xf32> to vector<8x1xf32>
    %cst_103 = arith.constant 4.000000e+00 : f32
    %305 = vector.broadcast %cst_103 : f32 to vector<8x1xf32>
    %306 = arith.divf %304, %305 : vector<8x1xf32>
    %307 = vector.broadcast %306 : vector<8x1xf32> to vector<8x4xf32>
    %308 = arith.subf %302, %307 : vector<8x4xf32>
    %309 = arith.mulf %308, %308 : vector<8x4xf32>
    %cst_104 = arith.constant dense<0.000000e+00> : vector<8xf32>
    %310 = vector.multi_reduction <add>, %309, %cst_104 [1] : vector<8x4xf32> to vector<8xf32>
    %311 = vector.shape_cast %310 : vector<8xf32> to vector<8x1xf32>
    %cst_105 = arith.constant 4.000000e+00 : f32
    %312 = vector.broadcast %cst_105 : f32 to vector<8x1xf32>
    %313 = arith.divf %311, %312 : vector<8x1xf32>
    %cst_106 = arith.constant 9.99999997E-7 : f32
    %314 = vector.broadcast %cst_106 : f32 to vector<8x1xf32>
    %315 = arith.addf %313, %314 : vector<8x1xf32>
    %316 = math.rsqrt %315 : vector<8x1xf32>
    %317 = vector.broadcast %316 : vector<8x1xf32> to vector<8x4xf32>
    %318 = arith.mulf %308, %317 : vector<8x4xf32>
    %319 = tpu.concatenate %265, %282, %301, %318 in 1 : vector<8x4xf32>, vector<8x4xf32>, vector<8x4xf32>, vector<8x4xf32> -> vector<8x16xf32>
    %cst_107 = arith.constant dense<0.000000e+00> : vector<8x32xf32>
    %320 = tpu.matmul %319, %0, %cst_107 {dimension_numbers = #tpu.dot_dimension_numbers<[1], [0], [0], [1], [0, 0, 1, 1], [], []>} : vector<8x16xf32>, vector<16x32xf32>, vector<8x32xf32> -> vector<8x32xf32>
    %321 = vector.broadcast %1 : vector<1x32xf32> to vector<8x32xf32>
    %322 = arith.addf %320, %321 : vector<8x32xf32>
    %c3_108 = arith.constant 3 : index
    %c0_109 = arith.constant 0 : index
    %c0_110 = arith.constant 0 : index
    %323 = vector.load %arg4[%c3_108, %c0_109, %c0_110] : memref<8x8x32xf32, #tpu.memory_space<vmem>>, vector<1x8x32xf32>
    %324 = vector.shape_cast %323 : vector<1x8x32xf32> to vector<8x32xf32>
    %325 = vector.shape_cast %322 : vector<8x32xf32> to vector<1x8x32xf32>
    tpu.vector_store %arg4[%c3_108, %c0_109, %c0_110], %325 {strides = array<i32>} : memref<8x8x32xf32, #tpu.memory_space<vmem>>, vector<1x8x32xf32>,
    %c4 = arith.constant 4 : index
    %c0_111 = arith.constant 0 : index
    %c0_112 = arith.constant 0 : index
    %c0_113 = arith.constant 0 : index
    %326 = vector.load %arg1[%c4, %c0_111, %c0_112, %c0_113] : memref<8x2x8x8xf32, #tpu.memory_space<vmem>>, vector<1x2x8x8xf32>
    %327 = vector.shape_cast %326 : vector<1x2x8x8xf32> to vector<2x8x8xf32>
    %328 = vector.extract_strided_slice %327 {offsets = [0, 0, 0], sizes = [1, 8, 8], strides = [1, 1, 1]} : vector<2x8x8xf32> to vector<1x8x8xf32>
    %329 = vector.shape_cast %328 : vector<1x8x8xf32> to vector<8x8xf32>
    %330 = vector.extract_strided_slice %329 {offsets = [0, 0], sizes = [8, 4], strides = [1, 1]} : vector<8x8xf32> to vector<8x4xf32>
    %cst_114 = arith.constant dense<0.000000e+00> : vector<8xf32>
    %331 = vector.multi_reduction <add>, %330, %cst_114 [1] : vector<8x4xf32> to vector<8xf32>
    %332 = vector.shape_cast %331 : vector<8xf32> to vector<8x1xf32>
    %cst_115 = arith.constant 4.000000e+00 : f32
    %333 = vector.broadcast %cst_115 : f32 to vector<8x1xf32>
    %334 = arith.divf %332, %333 : vector<8x1xf32>
    %335 = vector.broadcast %334 : vector<8x1xf32> to vector<8x4xf32>
    %336 = arith.subf %330, %335 : vector<8x4xf32>
    %337 = arith.mulf %336, %336 : vector<8x4xf32>
    %cst_116 = arith.constant dense<0.000000e+00> : vector<8xf32>
    %338 = vector.multi_reduction <add>, %337, %cst_116 [1] : vector<8x4xf32> to vector<8xf32>
    %339 = vector.shape_cast %338 : vector<8xf32> to vector<8x1xf32>
    %cst_117 = arith.constant 4.000000e+00 : f32
    %340 = vector.broadcast %cst_117 : f32 to vector<8x1xf32>
    %341 = arith.divf %339, %340 : vector<8x1xf32>
    %cst_118 = arith.constant 9.99999997E-7 : f32
    %342 = vector.broadcast %cst_118 : f32 to vector<8x1xf32>
    %343 = arith.addf %341, %342 : vector<8x1xf32>
    %344 = math.rsqrt %343 : vector<8x1xf32>
    %345 = vector.broadcast %344 : vector<8x1xf32> to vector<8x4xf32>
    %346 = arith.mulf %336, %345 : vector<8x4xf32>
    %347 = vector.extract_strided_slice %329 {offsets = [0, 4], sizes = [8, 4], strides = [1, 1]} : vector<8x8xf32> to vector<8x4xf32>
    %cst_119 = arith.constant dense<0.000000e+00> : vector<8xf32>
    %348 = vector.multi_reduction <add>, %347, %cst_119 [1] : vector<8x4xf32> to vector<8xf32>
    %349 = vector.shape_cast %348 : vector<8xf32> to vector<8x1xf32>
    %cst_120 = arith.constant 4.000000e+00 : f32
    %350 = vector.broadcast %cst_120 : f32 to vector<8x1xf32>
    %351 = arith.divf %349, %350 : vector<8x1xf32>
    %352 = vector.broadcast %351 : vector<8x1xf32> to vector<8x4xf32>
    %353 = arith.subf %347, %352 : vector<8x4xf32>
    %354 = arith.mulf %353, %353 : vector<8x4xf32>
    %cst_121 = arith.constant dense<0.000000e+00> : vector<8xf32>
    %355 = vector.multi_reduction <add>, %354, %cst_121 [1] : vector<8x4xf32> to vector<8xf32>
    %356 = vector.shape_cast %355 : vector<8xf32> to vector<8x1xf32>
    %cst_122 = arith.constant 4.000000e+00 : f32
    %357 = vector.broadcast %cst_122 : f32 to vector<8x1xf32>
    %358 = arith.divf %356, %357 : vector<8x1xf32>
    %cst_123 = arith.constant 9.99999997E-7 : f32
    %359 = vector.broadcast %cst_123 : f32 to vector<8x1xf32>
    %360 = arith.addf %358, %359 : vector<8x1xf32>
    %361 = math.rsqrt %360 : vector<8x1xf32>
    %362 = vector.broadcast %361 : vector<8x1xf32> to vector<8x4xf32>
    %363 = arith.mulf %353, %362 : vector<8x4xf32>
    %364 = vector.extract_strided_slice %327 {offsets = [1, 0, 0], sizes = [1, 8, 8], strides = [1, 1, 1]} : vector<2x8x8xf32> to vector<1x8x8xf32>
    %365 = vector.shape_cast %364 : vector<1x8x8xf32> to vector<8x8xf32>
    %366 = vector.extract_strided_slice %365 {offsets = [0, 0], sizes = [8, 4], strides = [1, 1]} : vector<8x8xf32> to vector<8x4xf32>
    %cst_124 = arith.constant dense<0.000000e+00> : vector<8xf32>
    %367 = vector.multi_reduction <add>, %366, %cst_124 [1] : vector<8x4xf32> to vector<8xf32>
    %368 = vector.shape_cast %367 : vector<8xf32> to vector<8x1xf32>
    %cst_125 = arith.constant 4.000000e+00 : f32
    %369 = vector.broadcast %cst_125 : f32 to vector<8x1xf32>
    %370 = arith.divf %368, %369 : vector<8x1xf32>
    %371 = vector.broadcast %370 : vector<8x1xf32> to vector<8x4xf32>
    %372 = arith.subf %366, %371 : vector<8x4xf32>
    %373 = arith.mulf %372, %372 : vector<8x4xf32>
    %cst_126 = arith.constant dense<0.000000e+00> : vector<8xf32>
    %374 = vector.multi_reduction <add>, %373, %cst_126 [1] : vector<8x4xf32> to vector<8xf32>
    %375 = vector.shape_cast %374 : vector<8xf32> to vector<8x1xf32>
    %cst_127 = arith.constant 4.000000e+00 : f32
    %376 = vector.broadcast %cst_127 : f32 to vector<8x1xf32>
    %377 = arith.divf %375, %376 : vector<8x1xf32>
    %cst_128 = arith.constant 9.99999997E-7 : f32
    %378 = vector.broadcast %cst_128 : f32 to vector<8x1xf32>
    %379 = arith.addf %377, %378 : vector<8x1xf32>
    %380 = math.rsqrt %379 : vector<8x1xf32>
    %381 = vector.broadcast %380 : vector<8x1xf32> to vector<8x4xf32>
    %382 = arith.mulf %372, %381 : vector<8x4xf32>
    %383 = vector.extract_strided_slice %365 {offsets = [0, 4], sizes = [8, 4], strides = [1, 1]} : vector<8x8xf32> to vector<8x4xf32>
    %cst_129 = arith.constant dense<0.000000e+00> : vector<8xf32>
    %384 = vector.multi_reduction <add>, %383, %cst_129 [1] : vector<8x4xf32> to vector<8xf32>
    %385 = vector.shape_cast %384 : vector<8xf32> to vector<8x1xf32>
    %cst_130 = arith.constant 4.000000e+00 : f32
    %386 = vector.broadcast %cst_130 : f32 to vector<8x1xf32>
    %387 = arith.divf %385, %386 : vector<8x1xf32>
    %388 = vector.broadcast %387 : vector<8x1xf32> to vector<8x4xf32>
    %389 = arith.subf %383, %388 : vector<8x4xf32>
    %390 = arith.mulf %389, %389 : vector<8x4xf32>
    %cst_131 = arith.constant dense<0.000000e+00> : vector<8xf32>
    %391 = vector.multi_reduction <add>, %390, %cst_131 [1] : vector<8x4xf32> to vector<8xf32>
    %392 = vector.shape_cast %391 : vector<8xf32> to vector<8x1xf32>
    %cst_132 = arith.constant 4.000000e+00 : f32
    %393 = vector.broadcast %cst_132 : f32 to vector<8x1xf32>
    %394 = arith.divf %392, %393 : vector<8x1xf32>
    %cst_133 = arith.constant 9.99999997E-7 : f32
    %395 = vector.broadcast %cst_133 : f32 to vector<8x1xf32>
    %396 = arith.addf %394, %395 : vector<8x1xf32>
    %397 = math.rsqrt %396 : vector<8x1xf32>
    %398 = vector.broadcast %397 : vector<8x1xf32> to vector<8x4xf32>
    %399 = arith.mulf %389, %398 : vector<8x4xf32>
    %400 = tpu.concatenate %346, %363, %382, %399 in 1 : vector<8x4xf32>, vector<8x4xf32>, vector<8x4xf32>, vector<8x4xf32> -> vector<8x16xf32>
    %cst_134 = arith.constant dense<0.000000e+00> : vector<8x32xf32>
    %401 = tpu.matmul %400, %0, %cst_134 {dimension_numbers = #tpu.dot_dimension_numbers<[1], [0], [0], [1], [0, 0, 1, 1], [], []>} : vector<8x16xf32>, vector<16x32xf32>, vector<8x32xf32> -> vector<8x32xf32>
    %402 = vector.broadcast %1 : vector<1x32xf32> to vector<8x32xf32>
    %403 = arith.addf %401, %402 : vector<8x32xf32>
    %c4_135 = arith.constant 4 : index
    %c0_136 = arith.constant 0 : index
    %c0_137 = arith.constant 0 : index
    %404 = vector.load %arg4[%c4_135, %c0_136, %c0_137] : memref<8x8x32xf32, #tpu.memory_space<vmem>>, vector<1x8x32xf32>
    %405 = vector.shape_cast %404 : vector<1x8x32xf32> to vector<8x32xf32>
    %406 = vector.shape_cast %403 : vector<8x32xf32> to vector<1x8x32xf32>
    tpu.vector_store %arg4[%c4_135, %c0_136, %c0_137], %406 {strides = array<i32>} : memref<8x8x32xf32, #tpu.memory_space<vmem>>, vector<1x8x32xf32>,
    %c5 = arith.constant 5 : index
    %c0_138 = arith.constant 0 : index
    %c0_139 = arith.constant 0 : index
    %c0_140 = arith.constant 0 : index
    %407 = vector.load %arg1[%c5, %c0_138, %c0_139, %c0_140] : memref<8x2x8x8xf32, #tpu.memory_space<vmem>>, vector<1x2x8x8xf32>
    %408 = vector.shape_cast %407 : vector<1x2x8x8xf32> to vector<2x8x8xf32>
    %409 = vector.extract_strided_slice %408 {offsets = [0, 0, 0], sizes = [1, 8, 8], strides = [1, 1, 1]} : vector<2x8x8xf32> to vector<1x8x8xf32>
    %410 = vector.shape_cast %409 : vector<1x8x8xf32> to vector<8x8xf32>
    %411 = vector.extract_strided_slice %410 {offsets = [0, 0], sizes = [8, 4], strides = [1, 1]} : vector<8x8xf32> to vector<8x4xf32>
    %cst_141 = arith.constant dense<0.000000e+00> : vector<8xf32>
    %412 = vector.multi_reduction <add>, %411, %cst_141 [1] : vector<8x4xf32> to vector<8xf32>
    %413 = vector.shape_cast %412 : vector<8xf32> to vector<8x1xf32>
    %cst_142 = arith.constant 4.000000e+00 : f32
    %414 = vector.broadcast %cst_142 : f32 to vector<8x1xf32>
    %415 = arith.divf %413, %414 : vector<8x1xf32>
    %416 = vector.broadcast %415 : vector<8x1xf32> to vector<8x4xf32>
    %417 = arith.subf %411, %416 : vector<8x4xf32>
    %418 = arith.mulf %417, %417 : vector<8x4xf32>
    %cst_143 = arith.constant dense<0.000000e+00> : vector<8xf32>
    %419 = vector.multi_reduction <add>, %418, %cst_143 [1] : vector<8x4xf32> to vector<8xf32>
    %420 = vector.shape_cast %419 : vector<8xf32> to vector<8x1xf32>
    %cst_144 = arith.constant 4.000000e+00 : f32
    %421 = vector.broadcast %cst_144 : f32 to vector<8x1xf32>
    %422 = arith.divf %420, %421 : vector<8x1xf32>
    %cst_145 = arith.constant 9.99999997E-7 : f32
    %423 = vector.broadcast %cst_145 : f32 to vector<8x1xf32>
    %424 = arith.addf %422, %423 : vector<8x1xf32>
    %425 = math.rsqrt %424 : vector<8x1xf32>
    %426 = vector.broadcast %425 : vector<8x1xf32> to vector<8x4xf32>
    %427 = arith.mulf %417, %426 : vector<8x4xf32>
    %428 = vector.extract_strided_slice %410 {offsets = [0, 4], sizes = [8, 4], strides = [1, 1]} : vector<8x8xf32> to vector<8x4xf32>
    %cst_146 = arith.constant dense<0.000000e+00> : vector<8xf32>
    %429 = vector.multi_reduction <add>, %428, %cst_146 [1] : vector<8x4xf32> to vector<8xf32>
    %430 = vector.shape_cast %429 : vector<8xf32> to vector<8x1xf32>
    %cst_147 = arith.constant 4.000000e+00 : f32
    %431 = vector.broadcast %cst_147 : f32 to vector<8x1xf32>
    %432 = arith.divf %430, %431 : vector<8x1xf32>
    %433 = vector.broadcast %432 : vector<8x1xf32> to vector<8x4xf32>
    %434 = arith.subf %428, %433 : vector<8x4xf32>
    %435 = arith.mulf %434, %434 : vector<8x4xf32>
    %cst_148 = arith.constant dense<0.000000e+00> : vector<8xf32>
    %436 = vector.multi_reduction <add>, %435, %cst_148 [1] : vector<8x4xf32> to vector<8xf32>
    %437 = vector.shape_cast %436 : vector<8xf32> to vector<8x1xf32>
    %cst_149 = arith.constant 4.000000e+00 : f32
    %438 = vector.broadcast %cst_149 : f32 to vector<8x1xf32>
    %439 = arith.divf %437, %438 : vector<8x1xf32>
    %cst_150 = arith.constant 9.99999997E-7 : f32
    %440 = vector.broadcast %cst_150 : f32 to vector<8x1xf32>
    %441 = arith.addf %439, %440 : vector<8x1xf32>
    %442 = math.rsqrt %441 : vector<8x1xf32>
    %443 = vector.broadcast %442 : vector<8x1xf32> to vector<8x4xf32>
    %444 = arith.mulf %434, %443 : vector<8x4xf32>
    %445 = vector.extract_strided_slice %408 {offsets = [1, 0, 0], sizes = [1, 8, 8], strides = [1, 1, 1]} : vector<2x8x8xf32> to vector<1x8x8xf32>
    %446 = vector.shape_cast %445 : vector<1x8x8xf32> to vector<8x8xf32>
    %447 = vector.extract_strided_slice %446 {offsets = [0, 0], sizes = [8, 4], strides = [1, 1]} : vector<8x8xf32> to vector<8x4xf32>
    %cst_151 = arith.constant dense<0.000000e+00> : vector<8xf32>
    %448 = vector.multi_reduction <add>, %447, %cst_151 [1] : vector<8x4xf32> to vector<8xf32>
    %449 = vector.shape_cast %448 : vector<8xf32> to vector<8x1xf32>
    %cst_152 = arith.constant 4.000000e+00 : f32
    %450 = vector.broadcast %cst_152 : f32 to vector<8x1xf32>
    %451 = arith.divf %449, %450 : vector<8x1xf32>
    %452 = vector.broadcast %451 : vector<8x1xf32> to vector<8x4xf32>
    %453 = arith.subf %447, %452 : vector<8x4xf32>
    %454 = arith.mulf %453, %453 : vector<8x4xf32>
    %cst_153 = arith.constant dense<0.000000e+00> : vector<8xf32>
    %455 = vector.multi_reduction <add>, %454, %cst_153 [1] : vector<8x4xf32> to vector<8xf32>
    %456 = vector.shape_cast %455 : vector<8xf32> to vector<8x1xf32>
    %cst_154 = arith.constant 4.000000e+00 : f32
    %457 = vector.broadcast %cst_154 : f32 to vector<8x1xf32>
    %458 = arith.divf %456, %457 : vector<8x1xf32>
    %cst_155 = arith.constant 9.99999997E-7 : f32
    %459 = vector.broadcast %cst_155 : f32 to vector<8x1xf32>
    %460 = arith.addf %458, %459 : vector<8x1xf32>
    %461 = math.rsqrt %460 : vector<8x1xf32>
    %462 = vector.broadcast %461 : vector<8x1xf32> to vector<8x4xf32>
    %463 = arith.mulf %453, %462 : vector<8x4xf32>
    %464 = vector.extract_strided_slice %446 {offsets = [0, 4], sizes = [8, 4], strides = [1, 1]} : vector<8x8xf32> to vector<8x4xf32>
    %cst_156 = arith.constant dense<0.000000e+00> : vector<8xf32>
    %465 = vector.multi_reduction <add>, %464, %cst_156 [1] : vector<8x4xf32> to vector<8xf32>
    %466 = vector.shape_cast %465 : vector<8xf32> to vector<8x1xf32>
    %cst_157 = arith.constant 4.000000e+00 : f32
    %467 = vector.broadcast %cst_157 : f32 to vector<8x1xf32>
    %468 = arith.divf %466, %467 : vector<8x1xf32>
    %469 = vector.broadcast %468 : vector<8x1xf32> to vector<8x4xf32>
    %470 = arith.subf %464, %469 : vector<8x4xf32>
    %471 = arith.mulf %470, %470 : vector<8x4xf32>
    %cst_158 = arith.constant dense<0.000000e+00> : vector<8xf32>
    %472 = vector.multi_reduction <add>, %471, %cst_158 [1] : vector<8x4xf32> to vector<8xf32>
    %473 = vector.shape_cast %472 : vector<8xf32> to vector<8x1xf32>
    %cst_159 = arith.constant 4.000000e+00 : f32
    %474 = vector.broadcast %cst_159 : f32 to vector<8x1xf32>
    %475 = arith.divf %473, %474 : vector<8x1xf32>
    %cst_160 = arith.constant 9.99999997E-7 : f32
    %476 = vector.broadcast %cst_160 : f32 to vector<8x1xf32>
    %477 = arith.addf %475, %476 : vector<8x1xf32>
    %478 = math.rsqrt %477 : vector<8x1xf32>
    %479 = vector.broadcast %478 : vector<8x1xf32> to vector<8x4xf32>
    %480 = arith.mulf %470, %479 : vector<8x4xf32>
    %481 = tpu.concatenate %427, %444, %463, %480 in 1 : vector<8x4xf32>, vector<8x4xf32>, vector<8x4xf32>, vector<8x4xf32> -> vector<8x16xf32>
    %cst_161 = arith.constant dense<0.000000e+00> : vector<8x32xf32>
    %482 = tpu.matmul %481, %0, %cst_161 {dimension_numbers = #tpu.dot_dimension_numbers<[1], [0], [0], [1], [0, 0, 1, 1], [], []>} : vector<8x16xf32>, vector<16x32xf32>, vector<8x32xf32> -> vector<8x32xf32>
    %483 = vector.broadcast %1 : vector<1x32xf32> to vector<8x32xf32>
    %484 = arith.addf %482, %483 : vector<8x32xf32>
    %c5_162 = arith.constant 5 : index
    %c0_163 = arith.constant 0 : index
    %c0_164 = arith.constant 0 : index
    %485 = vector.load %arg4[%c5_162, %c0_163, %c0_164] : memref<8x8x32xf32, #tpu.memory_space<vmem>>, vector<1x8x32xf32>
    %486 = vector.shape_cast %485 : vector<1x8x32xf32> to vector<8x32xf32>
    %487 = vector.shape_cast %484 : vector<8x32xf32> to vector<1x8x32xf32>
    tpu.vector_store %arg4[%c5_162, %c0_163, %c0_164], %487 {strides = array<i32>} : memref<8x8x32xf32, #tpu.memory_space<vmem>>, vector<1x8x32xf32>,
    %c6 = arith.constant 6 : index
    %c0_165 = arith.constant 0 : index
    %c0_166 = arith.constant 0 : index
    %c0_167 = arith.constant 0 : index
    %488 = vector.load %arg1[%c6, %c0_165, %c0_166, %c0_167] : memref<8x2x8x8xf32, #tpu.memory_space<vmem>>, vector<1x2x8x8xf32>
    %489 = vector.shape_cast %488 : vector<1x2x8x8xf32> to vector<2x8x8xf32>
    %490 = vector.extract_strided_slice %489 {offsets = [0, 0, 0], sizes = [1, 8, 8], strides = [1, 1, 1]} : vector<2x8x8xf32> to vector<1x8x8xf32>
    %491 = vector.shape_cast %490 : vector<1x8x8xf32> to vector<8x8xf32>
    %492 = vector.extract_strided_slice %491 {offsets = [0, 0], sizes = [8, 4], strides = [1, 1]} : vector<8x8xf32> to vector<8x4xf32>
    %cst_168 = arith.constant dense<0.000000e+00> : vector<8xf32>
    %493 = vector.multi_reduction <add>, %492, %cst_168 [1] : vector<8x4xf32> to vector<8xf32>
    %494 = vector.shape_cast %493 : vector<8xf32> to vector<8x1xf32>
    %cst_169 = arith.constant 4.000000e+00 : f32
    %495 = vector.broadcast %cst_169 : f32 to vector<8x1xf32>
    %496 = arith.divf %494, %495 : vector<8x1xf32>
    %497 = vector.broadcast %496 : vector<8x1xf32> to vector<8x4xf32>
    %498 = arith.subf %492, %497 : vector<8x4xf32>
    %499 = arith.mulf %498, %498 : vector<8x4xf32>
    %cst_170 = arith.constant dense<0.000000e+00> : vector<8xf32>
    %500 = vector.multi_reduction <add>, %499, %cst_170 [1] : vector<8x4xf32> to vector<8xf32>
    %501 = vector.shape_cast %500 : vector<8xf32> to vector<8x1xf32>
    %cst_171 = arith.constant 4.000000e+00 : f32
    %502 = vector.broadcast %cst_171 : f32 to vector<8x1xf32>
    %503 = arith.divf %501, %502 : vector<8x1xf32>
    %cst_172 = arith.constant 9.99999997E-7 : f32
    %504 = vector.broadcast %cst_172 : f32 to vector<8x1xf32>
    %505 = arith.addf %503, %504 : vector<8x1xf32>
    %506 = math.rsqrt %505 : vector<8x1xf32>
    %507 = vector.broadcast %506 : vector<8x1xf32> to vector<8x4xf32>
    %508 = arith.mulf %498, %507 : vector<8x4xf32>
    %509 = vector.extract_strided_slice %491 {offsets = [0, 4], sizes = [8, 4], strides = [1, 1]} : vector<8x8xf32> to vector<8x4xf32>
    %cst_173 = arith.constant dense<0.000000e+00> : vector<8xf32>
    %510 = vector.multi_reduction <add>, %509, %cst_173 [1] : vector<8x4xf32> to vector<8xf32>
    %511 = vector.shape_cast %510 : vector<8xf32> to vector<8x1xf32>
    %cst_174 = arith.constant 4.000000e+00 : f32
    %512 = vector.broadcast %cst_174 : f32 to vector<8x1xf32>
    %513 = arith.divf %511, %512 : vector<8x1xf32>
    %514 = vector.broadcast %513 : vector<8x1xf32> to vector<8x4xf32>
    %515 = arith.subf %509, %514 : vector<8x4xf32>
    %516 = arith.mulf %515, %515 : vector<8x4xf32>
    %cst_175 = arith.constant dense<0.000000e+00> : vector<8xf32>
    %517 = vector.multi_reduction <add>, %516, %cst_175 [1] : vector<8x4xf32> to vector<8xf32>
    %518 = vector.shape_cast %517 : vector<8xf32> to vector<8x1xf32>
    %cst_176 = arith.constant 4.000000e+00 : f32
    %519 = vector.broadcast %cst_176 : f32 to vector<8x1xf32>
    %520 = arith.divf %518, %519 : vector<8x1xf32>
    %cst_177 = arith.constant 9.99999997E-7 : f32
    %521 = vector.broadcast %cst_177 : f32 to vector<8x1xf32>
    %522 = arith.addf %520, %521 : vector<8x1xf32>
    %523 = math.rsqrt %522 : vector<8x1xf32>
    %524 = vector.broadcast %523 : vector<8x1xf32> to vector<8x4xf32>
    %525 = arith.mulf %515, %524 : vector<8x4xf32>
    %526 = vector.extract_strided_slice %489 {offsets = [1, 0, 0], sizes = [1, 8, 8], strides = [1, 1, 1]} : vector<2x8x8xf32> to vector<1x8x8xf32>
    %527 = vector.shape_cast %526 : vector<1x8x8xf32> to vector<8x8xf32>
    %528 = vector.extract_strided_slice %527 {offsets = [0, 0], sizes = [8, 4], strides = [1, 1]} : vector<8x8xf32> to vector<8x4xf32>
    %cst_178 = arith.constant dense<0.000000e+00> : vector<8xf32>
    %529 = vector.multi_reduction <add>, %528, %cst_178 [1] : vector<8x4xf32> to vector<8xf32>
    %530 = vector.shape_cast %529 : vector<8xf32> to vector<8x1xf32>
    %cst_179 = arith.constant 4.000000e+00 : f32
    %531 = vector.broadcast %cst_179 : f32 to vector<8x1xf32>
    %532 = arith.divf %530, %531 : vector<8x1xf32>
    %533 = vector.broadcast %532 : vector<8x1xf32> to vector<8x4xf32>
    %534 = arith.subf %528, %533 : vector<8x4xf32>
    %535 = arith.mulf %534, %534 : vector<8x4xf32>
    %cst_180 = arith.constant dense<0.000000e+00> : vector<8xf32>
    %536 = vector.multi_reduction <add>, %535, %cst_180 [1] : vector<8x4xf32> to vector<8xf32>
    %537 = vector.shape_cast %536 : vector<8xf32> to vector<8x1xf32>
    %cst_181 = arith.constant 4.000000e+00 : f32
    %538 = vector.broadcast %cst_181 : f32 to vector<8x1xf32>
    %539 = arith.divf %537, %538 : vector<8x1xf32>
    %cst_182 = arith.constant 9.99999997E-7 : f32
    %540 = vector.broadcast %cst_182 : f32 to vector<8x1xf32>
    %541 = arith.addf %539, %540 : vector<8x1xf32>
    %542 = math.rsqrt %541 : vector<8x1xf32>
    %543 = vector.broadcast %542 : vector<8x1xf32> to vector<8x4xf32>
    %544 = arith.mulf %534, %543 : vector<8x4xf32>
    %545 = vector.extract_strided_slice %527 {offsets = [0, 4], sizes = [8, 4], strides = [1, 1]} : vector<8x8xf32> to vector<8x4xf32>
    %cst_183 = arith.constant dense<0.000000e+00> : vector<8xf32>
    %546 = vector.multi_reduction <add>, %545, %cst_183 [1] : vector<8x4xf32> to vector<8xf32>
    %547 = vector.shape_cast %546 : vector<8xf32> to vector<8x1xf32>
    %cst_184 = arith.constant 4.000000e+00 : f32
    %548 = vector.broadcast %cst_184 : f32 to vector<8x1xf32>
    %549 = arith.divf %547, %548 : vector<8x1xf32>
    %550 = vector.broadcast %549 : vector<8x1xf32> to vector<8x4xf32>
    %551 = arith.subf %545, %550 : vector<8x4xf32>
    %552 = arith.mulf %551, %551 : vector<8x4xf32>
    %cst_185 = arith.constant dense<0.000000e+00> : vector<8xf32>
    %553 = vector.multi_reduction <add>, %552, %cst_185 [1] : vector<8x4xf32> to vector<8xf32>
    %554 = vector.shape_cast %553 : vector<8xf32> to vector<8x1xf32>
    %cst_186 = arith.constant 4.000000e+00 : f32
    %555 = vector.broadcast %cst_186 : f32 to vector<8x1xf32>
    %556 = arith.divf %554, %555 : vector<8x1xf32>
    %cst_187 = arith.constant 9.99999997E-7 : f32
    %557 = vector.broadcast %cst_187 : f32 to vector<8x1xf32>
    %558 = arith.addf %556, %557 : vector<8x1xf32>
    %559 = math.rsqrt %558 : vector<8x1xf32>
    %560 = vector.broadcast %559 : vector<8x1xf32> to vector<8x4xf32>
    %561 = arith.mulf %551, %560 : vector<8x4xf32>
    %562 = tpu.concatenate %508, %525, %544, %561 in 1 : vector<8x4xf32>, vector<8x4xf32>, vector<8x4xf32>, vector<8x4xf32> -> vector<8x16xf32>
    %cst_188 = arith.constant dense<0.000000e+00> : vector<8x32xf32>
    %563 = tpu.matmul %562, %0, %cst_188 {dimension_numbers = #tpu.dot_dimension_numbers<[1], [0], [0], [1], [0, 0, 1, 1], [], []>} : vector<8x16xf32>, vector<16x32xf32>, vector<8x32xf32> -> vector<8x32xf32>
    %564 = vector.broadcast %1 : vector<1x32xf32> to vector<8x32xf32>
    %565 = arith.addf %563, %564 : vector<8x32xf32>
    %c6_189 = arith.constant 6 : index
    %c0_190 = arith.constant 0 : index
    %c0_191 = arith.constant 0 : index
    %566 = vector.load %arg4[%c6_189, %c0_190, %c0_191] : memref<8x8x32xf32, #tpu.memory_space<vmem>>, vector<1x8x32xf32>
    %567 = vector.shape_cast %566 : vector<1x8x32xf32> to vector<8x32xf32>
    %568 = vector.shape_cast %565 : vector<8x32xf32> to vector<1x8x32xf32>
    tpu.vector_store %arg4[%c6_189, %c0_190, %c0_191], %568 {strides = array<i32>} : memref<8x8x32xf32, #tpu.memory_space<vmem>>, vector<1x8x32xf32>,
    %c7 = arith.constant 7 : index
    %c0_192 = arith.constant 0 : index
    %c0_193 = arith.constant 0 : index
    %c0_194 = arith.constant 0 : index
    %569 = vector.load %arg1[%c7, %c0_192, %c0_193, %c0_194] : memref<8x2x8x8xf32, #tpu.memory_space<vmem>>, vector<1x2x8x8xf32>
    %570 = vector.shape_cast %569 : vector<1x2x8x8xf32> to vector<2x8x8xf32>
    %571 = vector.extract_strided_slice %570 {offsets = [0, 0, 0], sizes = [1, 8, 8], strides = [1, 1, 1]} : vector<2x8x8xf32> to vector<1x8x8xf32>
    %572 = vector.shape_cast %571 : vector<1x8x8xf32> to vector<8x8xf32>
    %573 = vector.extract_strided_slice %572 {offsets = [0, 0], sizes = [8, 4], strides = [1, 1]} : vector<8x8xf32> to vector<8x4xf32>
    %cst_195 = arith.constant dense<0.000000e+00> : vector<8xf32>
    %574 = vector.multi_reduction <add>, %573, %cst_195 [1] : vector<8x4xf32> to vector<8xf32>
    %575 = vector.shape_cast %574 : vector<8xf32> to vector<8x1xf32>
    %cst_196 = arith.constant 4.000000e+00 : f32
    %576 = vector.broadcast %cst_196 : f32 to vector<8x1xf32>
    %577 = arith.divf %575, %576 : vector<8x1xf32>
    %578 = vector.broadcast %577 : vector<8x1xf32> to vector<8x4xf32>
    %579 = arith.subf %573, %578 : vector<8x4xf32>
    %580 = arith.mulf %579, %579 : vector<8x4xf32>
    %cst_197 = arith.constant dense<0.000000e+00> : vector<8xf32>
    %581 = vector.multi_reduction <add>, %580, %cst_197 [1] : vector<8x4xf32> to vector<8xf32>
    %582 = vector.shape_cast %581 : vector<8xf32> to vector<8x1xf32>
    %cst_198 = arith.constant 4.000000e+00 : f32
    %583 = vector.broadcast %cst_198 : f32 to vector<8x1xf32>
    %584 = arith.divf %582, %583 : vector<8x1xf32>
    %cst_199 = arith.constant 9.99999997E-7 : f32
    %585 = vector.broadcast %cst_199 : f32 to vector<8x1xf32>
    %586 = arith.addf %584, %585 : vector<8x1xf32>
    %587 = math.rsqrt %586 : vector<8x1xf32>
    %588 = vector.broadcast %587 : vector<8x1xf32> to vector<8x4xf32>
    %589 = arith.mulf %579, %588 : vector<8x4xf32>
    %590 = vector.extract_strided_slice %572 {offsets = [0, 4], sizes = [8, 4], strides = [1, 1]} : vector<8x8xf32> to vector<8x4xf32>
    %cst_200 = arith.constant dense<0.000000e+00> : vector<8xf32>
    %591 = vector.multi_reduction <add>, %590, %cst_200 [1] : vector<8x4xf32> to vector<8xf32>
    %592 = vector.shape_cast %591 : vector<8xf32> to vector<8x1xf32>
    %cst_201 = arith.constant 4.000000e+00 : f32
    %593 = vector.broadcast %cst_201 : f32 to vector<8x1xf32>
    %594 = arith.divf %592, %593 : vector<8x1xf32>
    %595 = vector.broadcast %594 : vector<8x1xf32> to vector<8x4xf32>
    %596 = arith.subf %590, %595 : vector<8x4xf32>
    %597 = arith.mulf %596, %596 : vector<8x4xf32>
    %cst_202 = arith.constant dense<0.000000e+00> : vector<8xf32>
    %598 = vector.multi_reduction <add>, %597, %cst_202 [1] : vector<8x4xf32> to vector<8xf32>
    %599 = vector.shape_cast %598 : vector<8xf32> to vector<8x1xf32>
    %cst_203 = arith.constant 4.000000e+00 : f32
    %600 = vector.broadcast %cst_203 : f32 to vector<8x1xf32>
    %601 = arith.divf %599, %600 : vector<8x1xf32>
    %cst_204 = arith.constant 9.99999997E-7 : f32
    %602 = vector.broadcast %cst_204 : f32 to vector<8x1xf32>
    %603 = arith.addf %601, %602 : vector<8x1xf32>
    %604 = math.rsqrt %603 : vector<8x1xf32>
    %605 = vector.broadcast %604 : vector<8x1xf32> to vector<8x4xf32>
    %606 = arith.mulf %596, %605 : vector<8x4xf32>
    %607 = vector.extract_strided_slice %570 {offsets = [1, 0, 0], sizes = [1, 8, 8], strides = [1, 1, 1]} : vector<2x8x8xf32> to vector<1x8x8xf32>
    %608 = vector.shape_cast %607 : vector<1x8x8xf32> to vector<8x8xf32>
    %609 = vector.extract_strided_slice %608 {offsets = [0, 0], sizes = [8, 4], strides = [1, 1]} : vector<8x8xf32> to vector<8x4xf32>
    %cst_205 = arith.constant dense<0.000000e+00> : vector<8xf32>
    %610 = vector.multi_reduction <add>, %609, %cst_205 [1] : vector<8x4xf32> to vector<8xf32>
    %611 = vector.shape_cast %610 : vector<8xf32> to vector<8x1xf32>
    %cst_206 = arith.constant 4.000000e+00 : f32
    %612 = vector.broadcast %cst_206 : f32 to vector<8x1xf32>
    %613 = arith.divf %611, %612 : vector<8x1xf32>
    %614 = vector.broadcast %613 : vector<8x1xf32> to vector<8x4xf32>
    %615 = arith.subf %609, %614 : vector<8x4xf32>
    %616 = arith.mulf %615, %615 : vector<8x4xf32>
    %cst_207 = arith.constant dense<0.000000e+00> : vector<8xf32>
    %617 = vector.multi_reduction <add>, %616, %cst_207 [1] : vector<8x4xf32> to vector<8xf32>
    %618 = vector.shape_cast %617 : vector<8xf32> to vector<8x1xf32>
    %cst_208 = arith.constant 4.000000e+00 : f32
    %619 = vector.broadcast %cst_208 : f32 to vector<8x1xf32>
    %620 = arith.divf %618, %619 : vector<8x1xf32>
    %cst_209 = arith.constant 9.99999997E-7 : f32
    %621 = vector.broadcast %cst_209 : f32 to vector<8x1xf32>
    %622 = arith.addf %620, %621 : vector<8x1xf32>
    %623 = math.rsqrt %622 : vector<8x1xf32>
    %624 = vector.broadcast %623 : vector<8x1xf32> to vector<8x4xf32>
    %625 = arith.mulf %615, %624 : vector<8x4xf32>
    %626 = vector.extract_strided_slice %608 {offsets = [0, 4], sizes = [8, 4], strides = [1, 1]} : vector<8x8xf32> to vector<8x4xf32>
    %cst_210 = arith.constant dense<0.000000e+00> : vector<8xf32>
    %627 = vector.multi_reduction <add>, %626, %cst_210 [1] : vector<8x4xf32> to vector<8xf32>
    %628 = vector.shape_cast %627 : vector<8xf32> to vector<8x1xf32>
    %cst_211 = arith.constant 4.000000e+00 : f32
    %629 = vector.broadcast %cst_211 : f32 to vector<8x1xf32>
    %630 = arith.divf %628, %629 : vector<8x1xf32>
    %631 = vector.broadcast %630 : vector<8x1xf32> to vector<8x4xf32>
    %632 = arith.subf %626, %631 : vector<8x4xf32>
    %633 = arith.mulf %632, %632 : vector<8x4xf32>
    %cst_212 = arith.constant dense<0.000000e+00> : vector<8xf32>
    %634 = vector.multi_reduction <add>, %633, %cst_212 [1] : vector<8x4xf32> to vector<8xf32>
    %635 = vector.shape_cast %634 : vector<8xf32> to vector<8x1xf32>
    %cst_213 = arith.constant 4.000000e+00 : f32
    %636 = vector.broadcast %cst_213 : f32 to vector<8x1xf32>
    %637 = arith.divf %635, %636 : vector<8x1xf32>
    %cst_214 = arith.constant 9.99999997E-7 : f32
    %638 = vector.broadcast %cst_214 : f32 to vector<8x1xf32>
    %639 = arith.addf %637, %638 : vector<8x1xf32>
    %640 = math.rsqrt %639 : vector<8x1xf32>
    %641 = vector.broadcast %640 : vector<8x1xf32> to vector<8x4xf32>
    %642 = arith.mulf %632, %641 : vector<8x4xf32>
    %643 = tpu.concatenate %589, %606, %625, %642 in 1 : vector<8x4xf32>, vector<8x4xf32>, vector<8x4xf32>, vector<8x4xf32> -> vector<8x16xf32>
    %cst_215 = arith.constant dense<0.000000e+00> : vector<8x32xf32>
    %644 = tpu.matmul %643, %0, %cst_215 {dimension_numbers = #tpu.dot_dimension_numbers<[1], [0], [0], [1], [0, 0, 1, 1], [], []>} : vector<8x16xf32>, vector<16x32xf32>, vector<8x32xf32> -> vector<8x32xf32>
    %645 = vector.broadcast %1 : vector<1x32xf32> to vector<8x32xf32>
    %646 = arith.addf %644, %645 : vector<8x32xf32>
    %c7_216 = arith.constant 7 : index
    %c0_217 = arith.constant 0 : index
    %c0_218 = arith.constant 0 : index
    %647 = vector.load %arg4[%c7_216, %c0_217, %c0_218] : memref<8x8x32xf32, #tpu.memory_space<vmem>>, vector<1x8x32xf32>
    %648 = vector.shape_cast %647 : vector<1x8x32xf32> to vector<8x32xf32>
    %649 = vector.shape_cast %646 : vector<8x32xf32> to vector<1x8x32xf32>
    tpu.vector_store %arg4[%c7_216, %c0_217, %c0_218], %649 {strides = array<i32>} : memref<8x8x32xf32, #tpu.memory_space<vmem>>, vector<1x8x32xf32>,
    return
  }
  func.func @transform_0(%arg0: i32) -> (i32, i32, i32, i32) {
    %c0_i32 = arith.constant 0 : i32
    %c0_i32_0 = arith.constant 0 : i32
    %c0_i32_1 = arith.constant 0 : i32
    %c0_i32_2 = arith.constant 0 : i32
    return %arg0, %c0_i32, %c0_i32_0, %c0_i32_1 : i32, i32, i32, i32
  }
  func.func @transform_1(%arg0: i32) -> (i32, i32) {
    %c0_i32 = arith.constant 0 : i32
    %c0_i32_0 = arith.constant 0 : i32
    %c0_i32_1 = arith.constant 0 : i32
    return %c0_i32, %c0_i32_0 : i32, i32
  }
  func.func @transform_2(%arg0: i32) -> (i32, i32) {
    %c0_i32 = arith.constant 0 : i32
    %c0_i32_0 = arith.constant 0 : i32
    %c0_i32_1 = arith.constant 0 : i32
    return %c0_i32, %c0_i32_0 : i32, i32
  }
  func.func @transform_3(%arg0: i32) -> (i32, i32, i32) {
    %c0_i32 = arith.constant 0 : i32
    %c0_i32_0 = arith.constant 0 : i32
    %c0_i32_1 = arith.constant 0 : i32
    return %arg0, %c0_i32, %c0_i32_0 : i32, i32, i32
  }
}

</mosaic_0001>

<bundles_post_ra>
// kernel: tpu_custom_call.1
= control target key start
LH: loop header
LB: loop body
LE: loop exit
PB: predicated region body
PF: predicated region fallthrough
CT: control target
= control target key end

     0   :  { %8 = vsyncpa [#allocation3], 0  ;;  %s2488_s0 = inlined_call_operand.vmem [shape: f32[16,2,8,8], index: 0, kind: input, shape index: {}]   ;;  %s2489_s1 = inlined_call_operand.vmem [shape: f32[16,32], index: 1, kind: input, shape index: {}]   ;;  %s2490_s2 = inlined_call_operand.vmem [shape: f32[1,32], index: 2, kind: input, shape index: {}]   ;;  %s2491_s3 = inlined_call_operand.hbm [shape: f32[16,8,32], index: 3, kind: output, shape index: {}]  }
   0x1   :  { %10 = vsyncpa [#allocation3 + $0x1], 0  ;;  %s1869_s12 = smov 0   ;;  %s1871_s13 = smov 0  }
   0x2   :  { %s1873_s14 = smov 0   ;;  %s1875_s15 = smov 0  }
   0x3 LB: > { %s1890_s16 = sadd.s32 4294967295, %s1840_s15   ;;  %s1520_s17 = sadd.s32 4294967294, %s1840_s15   ;;  %s1840_s15 = sphi %s1875_s15, %s2497_s15   ;;  %s1836_s14 = sphi %s1873_s14, %s2496_s14   ;;  %s1832_s13 = sphi %s1871_s13, %s2495_s13   ;;  %s1828_s12 = sphi %s1869_s12, %s2494_s12  }
   0x4   : > { %s1894_s18 = sadd.s32 1, %s1840_s15   ;;  %s91_s19 = sadd.s32 1, %s1836_s14 }
   0x5   : > { %s88_s20 = ssub.s32 %s1840_s15, %s1894_s18  ;;  %p101_p0 = scmp.ne.s32.totalorder %s1836_s14, %s1832_s13 }
   0x6   : > { %p89_p1 = scmp.eq.s32.totalorder %s88_s20, 0  ;;  %p102_p2 = scmp.eq.s32.totalorder %s1890_s16, 1 }
   0x7   : > { %p107_p3 = scmp.ne.s32.totalorder %s1832_s13, %s1828_s12  ;;  %p108_p4 = scmp.eq.s32.totalorder %s1520_s17, 1 }
   0x8   : > { %s1905_s21 = scalar_select %p89_p1, %s1836_s14, %s91_s19  }
   0x9   : > { %p1907_p5 = por %p102_p2, %p101_p0  ;;  %p1911_p6 = por %p108_p4, %p107_p3 }
   0xa   : > { %p1523_p7 = scmp.ge.s32.totalorder %s1840_s15, 1  ;;  %p142_p8 = scmp.lt.s32.totalorder %s1840_s15, 3 }
   0xc   : > { %p143_p9 = pnand %p1523_p7, %p142_p8 }
   0xd   : > { %s1525_s24 = sshll.u32 (!%p143_p9), %s1890_s16, 3  ;;  %vm180_vm0 = vcmask (!%p143_p9), 31744   ;;  %s1842_s29 = smov (!%p143_p9), 124   ;;  %vm259_vm1 = vcmask (!%p143_p9), 64512   ;;  %vm1845_vm2 = vmmov (!%p143_p9), 0   ;;  %vm261_vm3 = vcmask (!%p143_p9), 97280  }
   0xe   : > { %146 = sbr.rel (%p143_p9) target bundleno = 2848 (0xb20), region = 32  ;;  %p168_p10 = scmp.lt.s32.totalorder (!%p143_p9), %s1525_s24, 15  ;;  %vm269_vm4 = vcmask (!%p143_p9), 130048   ;;  %vm343_vm5 = vcmask (!%p143_p9), 261120  }
   0xf   : > { %s1843_s30 = smov (!%p143_p9), 8   ;;  %s164_s8 = sand.u32 (!%p143_p9), 1, %s1832_s13  }
  0x10   : > { %s1524_s9 = sshll.u32 (!%p143_p9), %s164_s8, 6  ;;  %s1564_s19 = sshll.u32 (!%p143_p9), %s1890_s16, 10 }
  0x11   : > { %s2301_s17 = scalar_lea.vmem (!%p143_p9), [#allocation2], %s1524_s9  ;;  %s2437_s26 = scalar_lea.hbm (!%p143_p9), %s2491_s3, %s1564_s19 }
  0x12   : > { %s1458_s20 = sshll.u32 (!%p143_p9), %s2301_s17, 4  ;;  %s2446_s16 = scalar_lea.sflag (!%p143_p9), [#allocation3], %s164_s8  ;;  %s2440_s20 = int_to_ptr.vmem [resolvable:$true] %s1458_s20 }
  0x13   : > { %s1778_s27 = scalar_lea.vmem (!%p143_p9), %s2440_s20, 1024 }
  0x14   : > { %p1779_p11 = scmp.ne.s32.totalorder (!%p143_p9), %s2440_s20, %s1778_s27 }
  0x15   : > { %s2499_s24 = smov (!%p168_p10, %s1525_s24), 15 }
  0x16   : > { %s1563_s25 = sshll.u32 %s2499_s24, 4  ;;  %p1780_p12 = pnand %p1779_p11, %p1907_p5 }
  0x17   : > { %s1921_s28 = scalar_lea.vmem %s2488_s0, %s1563_s25 }
  0x18   : > { %v1924_v0 = vld [vmem:[%s1921_s28] sm:$0xff]  ;;  %v1931_v2 = vld [vmem:[%s1921_s28 + $0x10] sm:$0xff]  ;;  %v1936_v4 = vld [vmem:[%s1921_s28 + $0x8] sm:$0xff]  ;;  %p1781_p13 = pneg %p1780_p12 }
  0x19   : > { %196 = vrot.lane.b32.xlu1 %v1924_v0, %s1842_s29  ;;  %v181_v1 = vsel %vm180_vm0, %v1924_v0, 0.0  ;;  %v348_v3 = vsel %vm180_vm0, %v1931_v2, 0.0  ;;  %v216_v5 = vsel %vm180_vm0, %v1936_v4, 0.0  ;;  %v1945_v6 = vld [vmem:[%s1921_s28 + $0x18] sm:$0xff]  ;;  %v1951_v12 = vld [vmem:[%s1921_s28 + $0x20] sm:$0xff]  ;;  %v1535_v51 = vld [vmem:[%s1921_s28 + $0x28] sm:$0xff] }
  0x1a   : > { %182 = vadd.xlane.f32.xlu0 %v181_v1  ;;  %v382_v7 = vsel %vm180_vm0, %v1945_v6, 0.0  ;;  %v505_v14 = vsel %vm180_vm0, %v1951_v12, 0.0  ;;  %v539_v53 = vsel %vm180_vm0, %v1535_v51, 0.0  ;;  %v2002_v62 = vld [vmem:[%s1921_s28 + $0x30] sm:$0xff] }
  0x1b   : > { %v662_v1 = vsel %vm180_vm0, %v2002_v62, 0.0 }
  0x1e   : > { %349 = vadd.xlane.f32.xlu0 %v348_v3 }
  0x3d   : > { %217 = vadd.xlane.f32.xlu1 %v216_v5 }
  0x4e   : > { %230 = vrot.lane.b32.xlu1 %v1936_v4, %s1842_s29 }
  0x52   : > { %362 = vrot.lane.b32.xlu1 %v1931_v2, %s1842_s29 }
  0x76   : > { %383 = vadd.xlane.f32.xlu1 %v382_v7 }
  0x8b   : > { %v197_v8 = vpop.permute.xlu1 %196 }
  0x8c   : > { %v199_v9 = vsel %vm180_vm0, %v197_v8, 0.0 }
  0x8d   : > { %200 = vadd.xlane.f32.xlu1 %v199_v9 }
  0xa7   : > { %v183_v17 = vpop.xlane.xlu0 %182 }
  0xa8   : > { %v185_v34 = vmul.f32 0.25, %v183_v17 }
  0xaa   : > { %v1978_v37 = vsub.f32 %v1924_v0, %v185_v34 }
  0xab   : > { %v350_v18 = vpop.xlane.xlu0 %349 }
  0xac   : > { %v351_v20 = vmul.f32 0.25, %v350_v18  ;;  %v187_v43 = vmul.f32 %v1978_v37, %v1978_v37 }
  0xae   : > { %v1963_v22 = vsub.f32 %v1931_v2, %v351_v20  ;;  %v188_v45 = vsel %vm180_vm0, %v187_v43, 0.0 }
  0xb0   : > { %v353_v27 = vmul.f32 %v1963_v22, %v1963_v22 }
  0xb2   : > { %v354_v29 = vsel %vm180_vm0, %v353_v27, 0.0 }
  0xca   : > { %v218_v10 = vpop.xlane.xlu1 %217 }
  0xcb   : > { %v219_v19 = vmul.f32 0.25, %v218_v10 }
  0xcd   : > { %v1960_v21 = vsub.f32 %v1936_v4, %v219_v19 }
  0xce   : > { %v231_v11 = vpop.permute.xlu1 %230 }
  0xcf   : > { %v233_v13 = vsel %vm180_vm0, %v231_v11, 0.0  ;;  %v221_v24 = vmul.f32 %v1960_v21, %v1960_v21 }
  0xd0   : > { %234 = vadd.xlane.f32.xlu0 %v233_v13 }
  0xd1   : > { %v222_v28 = vsel %vm180_vm0, %v221_v24, 0.0 }
  0xd2   : > { %v363_v15 = vpop.permute.xlu1 %362 }
  0xd3   : > { %v365_v16 = vsel %vm180_vm0, %v363_v15, 0.0 }
  0xd4   : > { %366 = vadd.xlane.f32.xlu1 %v365_v16  ;;  %506 = vadd.xlane.f32.xlu0 %v505_v14 }
  0xe5   : > { %396 = vrot.lane.b32.xlu1 %v1945_v6, %s1842_s29 }
 0x103   : > { %v384_v23 = vpop.xlane.xlu1 %383 }
 0x104   : > { %v385_v25 = vmul.f32 0.25, %v384_v23 }
 0x106   : > { %v1968_v26 = vsub.f32 %v1945_v6, %v385_v25 }
 0x108   : > { %v387_v30 = vmul.f32 %v1968_v26, %v1968_v26 }
 0x109   : > { %223 = vadd.xlane.f32.xlu1 %v222_v28 }
 0x10a   : > { %v388_v31 = vsel %vm180_vm0, %v387_v30, 0.0 }
 0x10d   : > { %355 = vadd.xlane.f32.xlu1 %v354_v29 }
 0x111   : > { %389 = vadd.xlane.f32.xlu1 %v388_v31 }
 0x11a   : > { %v201_v32 = vpop.xlane.xlu1 %200 }
 0x11b   : > { %v202_v3 = vmul.f32 0.25, %v201_v32 }
 0x11d   : > { %v2008_v5 = vsub.f32 %v1924_v0, %v202_v3 }
 0x11f   : > { %v204_v10 = vmul.f32 %v2008_v5, %v2008_v5 }
 0x15d   : > { %v235_v33 = vpop.xlane.xlu0 %234 }
 0x15e   : > { %v236_v7 = vmul.f32 0.25, %v235_v33 }
 0x160   : > { %v2011_v8 = vsub.f32 %v1936_v4, %v236_v7 }
 0x161   : > { %v367_v35 = vpop.xlane.xlu1 %366  ;;  %v507_v36 = vpop.xlane.xlu0 %506 }
 0x162   : > { %v508_v38 = vmul.f32 0.25, %v507_v36  ;;  %v368_v9 = vmul.f32 0.25, %v367_v35  ;;  %v238_v15 = vmul.f32 %v2011_v8, %v2011_v8 }
 0x164   : > { %v1981_v39 = vsub.f32 %v1951_v12, %v508_v38  ;;  %v2017_v13 = vsub.f32 %v1931_v2, %v368_v9 }
 0x165   : > { %v397_v40 = vpop.permute.xlu1 %396 }
 0x166   : > { %v399_v41 = vsel %vm180_vm0, %v397_v40, 0.0  ;;  %v510_v42 = vmul.f32 %v1981_v39, %v1981_v39  ;;  %v370_v16 = vmul.f32 %v2017_v13, %v2017_v13 }
 0x167   : > { %400 = vadd.xlane.f32.xlu0 %v399_v41 }
 0x168   : > { %v511_v44 = vsel %vm180_vm0, %v510_v42, 0.0 }
 0x169   : > { %512 = vadd.xlane.f32.xlu1 %v511_v44 }
 0x16b   : > { %189 = vadd.xlane.f32.xlu0 %v188_v45 }
 0x17a   : > { %519 = vrot.lane.b32.xlu1 %v1951_v12, %s1842_s29 }
 0x196   : > { %v224_v46 = vpop.xlane.xlu1 %223 }
 0x19a   : > { %v1992_v47 = vpop.xlane.xlu1 %355 }
 0x19b   : > { %v357_v3 = vmul.f32 0.25, %v1992_v47 }
 0x19d   : > { %v358_v9 = vadd.f32 1e-06, %v357_v3 }
 0x19e   : > { %v390_v48 = vpop.xlane.xlu1 %389 }
 0x19f   : > { %v391_v20 = vmul.f32 0.25, %v390_v48 }
 0x1a1   : > { %v392_v23 = vadd.f32 1e-06, %v391_v20 }
 0x1f4   : > { %v401_v11 = vpop.xlane.xlu0 %400 }
 0x1f5   : > { %v402_v14 = vmul.f32 0.25, %v401_v11 }
 0x1f6   : > { %v1994_v49 = vpop.xlane.xlu1 %512 }
 0x1f7   : > { %v2023_v0 = vsub.f32 %v1945_v6, %v402_v14  ;;  %v225_v6 = vmul.f32 0.25, %v224_v46 }
 0x1f8   : > { %v2037_v24 = vpop.xlane.xlu0 %189 }
 0x1f9   : > { %v404_v2 = vmul.f32 %v2023_v0, %v2023_v0  ;;  %v226_v19 = vadd.f32 1e-06, %v225_v6 }
 0x1fa   : > { %v520_v50 = vpop.permute.xlu1 %519 }
 0x1fb   : > { %v522_v52 = vsel %vm180_vm0, %v520_v50, 0.0  ;;  %1714 = vrsqrt.f32 %v226_v19 }
 0x1fc   : > { %523 = vadd.xlane.f32.xlu1 %v522_v52  ;;  %1716 = vrsqrt.f32 %v392_v23 }
 0x200   : > { %540 = vadd.xlane.f32.xlu1 %v539_v53 }
 0x205   : > { %v1715_v33 = vpop.eup %1714 }
 0x206   : > { %v228_v35 = vmul.f32 %v1715_v33, %v1960_v21  ;;  %v1717_v38 = vpop.eup %1716 }
 0x207   : > { %v394_v41 = vmul.f32 %v1717_v38, %v1968_v26 }
 0x289   : > { %v524_v54 = vpop.xlane.xlu1 %523 }
 0x28a   : > { %v525_v4 = vmul.f32 0.25, %v524_v54 }
 0x28c   : > { %v2029_v17 = vsub.f32 %v1951_v12, %v525_v4 }
 0x28d   : > { %v541_v55 = vpop.xlane.xlu1 %540 }
 0x28e   : > { %v542_v56 = vmul.f32 0.25, %v541_v55  ;;  %v527_v18 = vmul.f32 %v2029_v17, %v2029_v17 }
 0x290   : > { %v543_v57 = vsub.f32 %v1535_v51, %v542_v56 }
 0x292   : > { %v544_v58 = vmul.f32 %v543_v57, %v543_v57 }
 0x294   : > { %v545_v59 = vsel %vm180_vm0, %v544_v58, 0.0  ;;  %v2064_v58 = vld [vmem:[%s1921_s28 + $0x38] sm:$0xff] }
 0x295   : > { %546 = vadd.xlane.f32.xlu1 %v545_v59 }
 0x2a6   : > { %553 = vrot.lane.b32.xlu1 %v1535_v51, %s1842_s29 }
 0x322   : > { %v547_v60 = vpop.xlane.xlu1 %546 }
 0x323   : > { %v548_v25 = vmul.f32 0.25, %v547_v60  ;;  %v696_v60 = vsel %vm180_vm0, %v2064_v58, 0.0 }
 0x325   : > { %v549_v12 = vadd.f32 1e-06, %v548_v25 }
 0x326   : > { %v554_v61 = vpop.permute.xlu1 %553 }
 0x327   : > { %v556_v63 = vsel %vm180_vm0, %v554_v61, 0.0  ;;  %1718 = vrsqrt.f32 %v549_v12 }
 0x328   : > { %557 = vadd.xlane.f32.xlu0 %v556_v63  ;;  %1720 = vrsqrt.f32 %v358_v9 }
 0x32c   : > { %663 = vadd.xlane.f32.xlu0 %v662_v1 }
 0x331   : > { %v1719_v42 = vpop.eup %1718 }
 0x332   : > { %v551_v43 = vmul.f32 %v1719_v42, %v543_v57  ;;  %v1721_v6 = vpop.eup %1720 }
 0x333   : > { %v360_v47 = vmul.f32 %v1721_v6, %v1963_v22  ;;  %v2138_v6 = vld [vmem:[%s1921_s28 + $0x68] sm:$0xff] }
 0x342   : > { %206 = vrot.lane.b32.xlu0 %v204_v10, %s1842_s29  ;;  %v514_v10 = vmul.f32 0.25, %v1994_v49 }
 0x346   : > { %240 = vrot.lane.b32.xlu0 %v238_v15, %s1842_s29  ;;  %v515_v15 = vadd.f32 1e-06, %v514_v10  ;;  %v2112_v10 = vld [vmem:[%s1921_s28 + $0x40] sm:$0xff] }
 0x34a   : > { %372 = vrot.lane.b32.xlu0 %v370_v16, %s1842_s29 }
 0x34e   : > { %406 = vrot.lane.b32.xlu0 %v404_v2, %s1842_s29 }
 0x352   : > { %529 = vrot.lane.b32.xlu0 %v527_v18, %s1842_s29 }
 0x3b5   : > { %v558_v27 = vpop.xlane.xlu0 %557 }
 0x3b6   : > { %v559_v28 = vmul.f32 0.25, %v558_v27 }
 0x3b8   : > { %v2039_v29 = vsub.f32 %v1535_v51, %v559_v28 }
 0x3b9   : > { %v664_v30 = vpop.xlane.xlu0 %663 }
 0x3ba   : > { %v665_v31 = vmul.f32 0.25, %v664_v30  ;;  %v561_v32 = vmul.f32 %v2039_v29, %v2039_v29 }
 0x3bc   : > { %v2044_v34 = vsub.f32 %v2002_v62, %v665_v31  ;;  %563 = vrot.lane.b32.xlu0 %v561_v32, %s1842_s29 }
 0x3bd   : > { %v207_v21 = vpop.permute.xlu0 %206 }
 0x3be   : > { %v667_v36 = vmul.f32 %v2044_v34, %v2044_v34  ;;  %v209_v48 = vsel %vm180_vm0, %v207_v21, 0.0 }
 0x3c0   : > { %251 = vrot.lane.b32.xlu0 %v228_v35, %s1843_s30  ;;  %v668_v40 = vsel %vm180_vm0, %v667_v36, 0.0 }
 0x3c1   : > { %669 = vadd.xlane.f32.xlu1 %v668_v40  ;;  %v241_v44 = vpop.permute.xlu0 %240 }
 0x3c2   : > { %v243_v52 = vsel %vm180_vm0, %v241_v44, 0.0 }
 0x3c4   : > { %417 = vrot.lane.b32.xlu0 %v394_v41, %s1843_s30 }
 0x3c5   : > { %v373_v45 = vpop.permute.xlu0 %372 }
 0x3c6   : > { %v375_v50 = vsel %vm180_vm0, %v373_v45, 0.0 }
 0x3c8   : > { %574 = vrot.lane.b32.xlu0 %v551_v43, %s1843_s30 }
 0x3c9   : > { %v407_v46 = vpop.permute.xlu0 %406 }
 0x3ca   : > { %v409_v53 = vsel %vm180_vm0, %v407_v46, 0.0 }
 0x3cd   : > { %v530_v26 = vpop.permute.xlu0 %529 }
 0x3ce   : > { %v532_v51 = vsel %vm180_vm0, %v530_v26, 0.0 }
 0x3d2   : > { %676 = vrot.lane.b32.xlu1 %v2002_v62, %s1842_s29 }
 0x3e7   : > { %210 = vadd.xlane.f32.xlu0 %v209_v48 }
 0x3eb   : > { %376 = vadd.xlane.f32.xlu0 %v375_v50 }
 0x3ef   : > { %533 = vadd.xlane.f32.xlu0 %v532_v51 }
 0x3f6   : > { %244 = vadd.xlane.f32.xlu1 %v243_v52 }
 0x3fa   : > { %410 = vadd.xlane.f32.xlu1 %v409_v53 }
 0x42e   : > { %v564_v54 = vpop.permute.xlu0 %563 }
 0x42f   : > { %v566_v55 = vsel %vm180_vm0, %v564_v54, 0.0 }
 0x430   : > { %567 = vadd.xlane.f32.xlu1 %v566_v55 }
 0x432   : > { %v2069_v61 = vpop.permute.xlu0 %251 }
 0x436   : > { %v2071_v63 = vpop.permute.xlu0 %417 }
 0x43a   : > { %v575_v1 = vpop.permute.xlu0 %574 }
 0x44e   : > { %v670_v56 = vpop.xlane.xlu1 %669 }
 0x44f   : > { %v671_v45 = vmul.f32 0.25, %v670_v56 }
 0x451   : > { %v672_v46 = vadd.f32 1e-06, %v671_v45  ;;  %v176_v45 = vld [vmem:[%s2489_s1 + $0x8] sm:$0xff] }
 0x452   : > { %v677_v57 = vpop.permute.xlu1 %676 }
 0x453   : > { %v679_v59 = vsel %vm180_vm0, %v677_v57, 0.0 }
 0x454   : > { %680 = vadd.xlane.f32.xlu1 %v679_v59 }
 0x458   : > { %697 = vadd.xlane.f32.xlu1 %v696_v60 }
 0x474   : > { %v2074_v7 = vpop.xlane.xlu0 %210 }
 0x478   : > { %v377_v11 = vpop.xlane.xlu0 %376 }
 0x479   : > { %v378_v14 = vmul.f32 0.25, %v377_v11  ;;  %v819_v11 = vsel %vm180_vm0, %v2112_v10, 0.0 }
 0x47b   : > { %v379_v4 = vadd.f32 1e-06, %v378_v14 }
 0x47c   : > { %v534_v16 = vpop.xlane.xlu0 %533 }
 0x47d   : > { %1722 = vrsqrt.f32 %v379_v4  ;;  %v535_v2 = vmul.f32 0.25, %v534_v16 }
 0x47e   : > { %1724 = vrsqrt.f32 %v515_v15 }
 0x47f   : > { %v536_v18 = vadd.f32 1e-06, %v535_v2  ;;  %v2128_v2 = vld [vmem:[%s1921_s28 + $0x48] sm:$0xff] }
 0x481   : > { %1726 = vrsqrt.f32 %v536_v18  ;;  %v2133_v18 = vld [vmem:[%s1921_s28 + $0x58] sm:$0xff] }
 0x482   : > { %1728 = vrsqrt.f32 %v672_v46 }
 0x483   : > { %v2088_v31 = vpop.xlane.xlu1 %244 }
 0x487   : > { %v1723_v19 = vpop.eup %1722  ;;  %v2090_v22 = vpop.xlane.xlu1 %410 }
 0x488   : > { %v381_v20 = vmul.f32 %v1723_v19, %v2017_v13  ;;  %v1725_v23 = vpop.eup %1724 }
 0x489   : > { %v517_v12 = vmul.f32 %v1725_v23, %v1981_v39 }
 0x48a   : > { %v2080_v49 = vsel %vm180_vm0, %v360_v47, %v381_v20 }
 0x48b   : > { %v1727_v25 = vpop.eup %1726 }
 0x48c   : > { %v538_v27 = vmul.f32 %v1727_v25, %v2029_v17  ;;  %v1729_v51 = vpop.eup %1728 }
 0x48d   : > { %v674_v53 = vmul.f32 %v1729_v51, %v2044_v34 }
 0x48e   : > { %v581_v28 = vsel %vm180_vm0, %v517_v12, %v538_v27 }
 0x48f   : > { %v2086_v30 = vsel %vm259_vm1, %v581_v28, %v575_v1 }
 0x4bd   : > { %v2092_v13 = vpop.xlane.xlu1 %567 }
 0x4e1   : > { %v681_v32 = vpop.xlane.xlu1 %680 }
 0x4e2   : > { %v682_v33 = vmul.f32 0.25, %v681_v32  ;;  %v2150_v32 = vld [vmem:[%s1921_s28 + $0x50] sm:$0xff] }
 0x4e4   : > { %v683_v35 = vsub.f32 %v2002_v62, %v682_v33 }
 0x4e5   : > { %v698_v36 = vpop.xlane.xlu1 %697 }
 0x4e6   : > { %v699_v39 = vmul.f32 0.25, %v698_v36  ;;  %v684_v38 = vmul.f32 %v683_v35, %v683_v35 }
 0x4e8   : > { %v700_v17 = vsub.f32 %v2064_v58, %v699_v39  ;;  %686 = vrot.lane.b32.xlu0 %v684_v38, %s1842_s29  ;;  %v246_v38 = vmul.f32 0.25, %v2088_v31  ;;  %v175_v31 = vld [vmem:[%s2489_s1] sm:$0xff] }
 0x4e9   : > { %v2166_v46 = vpack.c.bf16 %v176_v45, %v175_v31 }
 0x4ea   : > { %v701_v40 = vmul.f32 %v700_v17, %v700_v17 }
 0x4ec   : > { %v702_v41 = vsel %vm180_vm0, %v701_v40, 0.0 }
 0x4ed   : > { %703 = vadd.xlane.f32.xlu1 %v702_v41  ;;  %v247_v41 = vadd.f32 1e-06, %v246_v38 }
 0x4fe   : > { %710 = vrot.lane.b32.xlu1 %v2064_v58, %s1842_s29 }
 0x55a   : > { %v687_v42 = vpop.permute.xlu0 %686 }
 0x55b   : > { %v689_v43 = vsel %vm180_vm0, %v687_v42, 0.0  ;;  %v412_v42 = vmul.f32 0.25, %v2090_v22  ;;  %v1844_v22 = vmov 0.0|0.0  }
 0x55c   : > { %690 = vadd.xlane.f32.xlu0 %v689_v43  ;;  %1645 = vmatprep.subr.bf16.mxu0 %v1844_v22 }
 0x55d   : > { %v413_v43 = vadd.f32 1e-06, %v412_v42  ;;  %1648 = vmatprep.subr.bf16.mxu1 %v1844_v22  ;;  %1647 = vmatpush3.bf16.msra.mxu0 %v2166_v46 }
 0x55e   : > { %1650 = vmatpush3.bf16.msra.mxu1 %v2166_v46  ;;  %1651 = vmatprep.subr.bf16.mxu0 %v1844_v22 }
 0x55f   : > { %1654 = vmatprep.subr.bf16.mxu1 %v1844_v22 }
 0x57a   : > { %v704_v21 = vpop.xlane.xlu1 %703 }
 0x57b   : > { %v705_v57 = vmul.f32 0.25, %v704_v21  ;;  %v569_v21 = vmul.f32 0.25, %v2092_v13 }
 0x57d   : > { %v706_v59 = vadd.f32 1e-06, %v705_v57 }
 0x57e   : > { %v711_v62 = vpop.permute.xlu1 %710 }
 0x57f   : > { %v713_v44 = vsel %vm180_vm0, %v711_v62, 0.0  ;;  %v570_v62 = vadd.f32 1e-06, %v569_v21 }
 0x580   : > { %714 = vadd.xlane.f32.xlu0 %v713_v44 }
 0x5e9   : > { %v691_v48 = vpop.xlane.xlu0 %690 }
 0x5ea   : > { %v692_v50 = vmul.f32 0.25, %v691_v48 }
 0x5ec   : > { %v693_v26 = vadd.f32 1e-06, %v692_v50  ;;  %v1846_v50 = vmov 0.0  }
 0x5ed   : > { %1593 = vmatprep.mubr.msk.f32.mxu0 %vm1845_vm2, %v1846_v50  ;;  %1600 = vmatprep.mubr.msk.f32.mxu1 %vm1845_vm2, %v1846_v50 }
 0x5ee   : > { %1730 = vrsqrt.f32 %v693_v26 }
 0x5ef   : > { %1732 = vrsqrt.f32 %v706_v59  ;;  %v2187_v59 = vld [vmem:[%s1921_s28 + $0x60] sm:$0xff] }
 0x5f0   : > { %1734 = vrsqrt.f32 %v247_v41 }
 0x5f1   : > { %1736 = vrsqrt.f32 %v413_v43 }
 0x5f2   : > { %1738 = vrsqrt.f32 %v570_v62 }
 0x5f8   : > { %v1731_v52 = vpop.eup %1730 }
 0x5f9   : > { %v695_v54 = vmul.f32 %v1731_v52, %v683_v35  ;;  %v1733_v9 = vpop.eup %1732 }
 0x5fa   : > { %v708_v34 = vmul.f32 %v1733_v9, %v700_v17  ;;  %v1735_v13 = vpop.eup %1734 }
 0x5fb   : > { %v738_v55 = vsel %vm180_vm0, %v674_v53, %v695_v54  ;;  %v249_v26 = vmul.f32 %v1735_v13, %v2011_v8  ;;  %v1737_v51 = vpop.eup %1736  ;;  %v2192_v8 = vld [vmem:[%s1921_s28 + $0x70] sm:$0xff] }
 0x5fc   : > { %v415_v52 = vmul.f32 %v1737_v51, %v2023_v0  ;;  %v1739_v53 = vpop.eup %1738 }
 0x5fd   : > { %v572_v54 = vmul.f32 %v1739_v53, %v2039_v29 }
 0x60d   : > { %v715_v60 = vpop.xlane.xlu0 %714 }
 0x60e   : > { %v716_v56 = vmul.f32 0.25, %v715_v60 }
 0x610   : > { %v2105_v1 = vsub.f32 %v2064_v58, %v716_v56  ;;  %v2117_v58 = vld [vmem:[%s1921_s28 + $0x78] sm:$0xff]  ;;  %s1847_s28 = smov [#allocation2]  }
 0x611   : > { %v1324_v31 = vsel %vm180_vm0, %v2117_v58, 0.0 }
 0x612   : > { %v718_v3 = vmul.f32 %v2105_v1, %v2105_v1 }
 0x614   : > { %720 = vrot.lane.b32.xlu0 %v718_v3, %s1842_s29  ;;  %v1010_v3 = vsel %vm180_vm0, %v2133_v18, 0.0 }
 0x618   : > { %731 = vrot.lane.b32.xlu0 %v708_v34, %s1843_s30  ;;  %v212_v34 = vmul.f32 0.25, %v2074_v7 }
 0x637   : > { %820 = vadd.xlane.f32.xlu0 %v819_v11  ;;  %v191_v11 = vmul.f32 0.25, %v2037_v24 }
 0x64d   : > { %1338 = vrot.lane.b32.xlu0 %v2117_v58, %s1842_s29 }
 0x651   : > { %833 = vrot.lane.b32.xlu0 %v2112_v10, %s1842_s29 }
 0x686   : > { %v721_v14 = vpop.permute.xlu0 %720 }
 0x687   : > { %v723_v15 = vsel %vm180_vm0, %v721_v14, 0.0  ;;  %v213_v14 = vadd.f32 1e-06, %v212_v34 }
 0x688   : > { %724 = vadd.xlane.f32.xlu1 %v723_v15  ;;  %v192_v15 = vadd.f32 1e-06, %v191_v11 }
 0x68a   : > { %v732_v4 = vpop.permute.xlu0 %731 }
 0x68b   : > { %v2125_v16 = vsel %vm259_vm1, %v738_v55, %v732_v4 }
 0x699   : > { %867 = vrot.lane.b32.xlu1 %v2128_v2, %s1842_s29 }
 0x69d   : > { %1024 = vrot.lane.b32.xlu1 %v2133_v18, %s1842_s29 }
 0x6a1   : > { %1181 = vrot.lane.b32.xlu1 %v2138_v6, %s1842_s29 }
 0x6c4   : > { %v821_v19 = vpop.xlane.xlu0 %820 }
 0x6c5   : > { %v822_v47 = vmul.f32 0.25, %v821_v19 }
 0x6c7   : > { %v2143_v20 = vsub.f32 %v2112_v10, %v822_v47 }
 0x6c8   : > { %v1339_v23 = vpop.permute.xlu0 %1338 }
 0x6c9   : > { %v824_v25 = vmul.f32 %v2143_v20, %v2143_v20  ;;  %v1341_v17 = vsel %vm180_vm0, %v1339_v23, 0.0 }
 0x6cb   : > { %v825_v12 = vsel %vm180_vm0, %v824_v25, 0.0 }
 0x6cc   : > { %826 = vadd.xlane.f32.xlu1 %v825_v12  ;;  %v834_v27 = vpop.permute.xlu0 %833 }
 0x6cd   : > { %v836_v28 = vsel %vm180_vm0, %v834_v27, 0.0 }
 0x6ce   : > { %837 = vadd.xlane.f32.xlu0 %v836_v28 }
 0x6dd   : > { %990 = vrot.lane.b32.xlu1 %v2150_v32, %s1842_s29 }
 0x715   : > { %v725_v33 = vpop.xlane.xlu1 %724 }
 0x716   : > { %v726_v44 = vmul.f32 0.25, %v725_v33 }
 0x718   : > { %v727_v48 = vadd.f32 1e-06, %v726_v44 }
 0x719   : > { %v868_v35 = vpop.permute.xlu1 %867 }
 0x71a   : > { %v870_v36 = vsel %vm180_vm0, %v868_v35, 0.0  ;;  %1740 = vrsqrt.f32 %v727_v48 }
 0x71b   : > { %871 = vadd.xlane.f32.xlu1 %v870_v36  ;;  %1742 = vrsqrt.f32 %v213_v14 }
 0x71c   : > { %1744 = vrsqrt.f32 %v192_v15 }
 0x71d   : > { %v1025_v39 = vpop.permute.xlu1 %1024 }
 0x71e   : > { %v1027_v40 = vsel %vm180_vm0, %v1025_v39, 0.0 }
 0x71f   : > { %1342 = vadd.xlane.f32.xlu1 %v1341_v17  ;;  %1028 = vadd.xlane.f32.xlu0 %v1027_v40  ;;  %v425_v40 = vsel %vm259_vm1, %v2080_v49, %v2071_v63 }
 0x721   : > { %v1182_v0 = vpop.permute.xlu1 %1181 }
 0x722   : > { %v1184_v9 = vsel %vm180_vm0, %v1182_v0, 0.0 }
 0x724   : > { %v1741_v55 = vpop.eup %1740 }
 0x725   : > { %v729_v57 = vmul.f32 %v1741_v55, %v2105_v1  ;;  %v853_v1 = vsel %vm180_vm0, %v2128_v2, 0.0  ;;  %v1743_v4 = vpop.eup %1742 }
 0x726   : > { %v1745_v47 = vpop.eup %1744  ;;  %v215_v12 = vmul.f32 %v1743_v4, %v2008_v5 }
 0x727   : > { %v194_v28 = vmul.f32 %v1745_v47, %v1978_v37 }
 0x729   : > { %v258_v36 = vsel %vm180_vm0, %v194_v28, %v215_v12 }
 0x72a   : > { %v260_v5 = vsel %vm259_vm1, %v258_v36, %v2069_v61 }
 0x735   : > { %255 = vrot.lane.b32.xlu0 %v249_v26, %s1843_s30 }
 0x739   : > { %421 = vrot.lane.b32.xlu0 %v415_v52, %s1843_s30 }
 0x73d   : > { %578 = vrot.lane.b32.xlu0 %v572_v54, %s1843_s30 }
 0x741   : > { %735 = vrot.lane.b32.xlu0 %v729_v57, %s1843_s30 }
 0x745   : > { %1147 = vrot.lane.b32.xlu0 %v2187_v59, %s1842_s29 }
 0x749   : > { %1304 = vrot.lane.b32.xlu0 %v2192_v8, %s1842_s29 }
 0x759   : > { %v2196_v60 = vpop.xlane.xlu1 %826 }
 0x75b   : > { %v838_v19 = vpop.xlane.xlu0 %837 }
 0x75c   : > { %v839_v26 = vmul.f32 0.25, %v838_v19 }
 0x75d   : > { %v991_v29 = vpop.permute.xlu1 %990 }
 0x75e   : > { %v993_v56 = vsel %vm180_vm0, %v991_v29, 0.0  ;;  %v2268_v53 = vsub.f32 %v2112_v10, %v839_v26 }
 0x75f   : > { %994 = vadd.xlane.f32.xlu1 %v993_v56 }
 0x760   : > { %v841_v55 = vmul.f32 %v2268_v53, %v2268_v53 }
 0x763   : > { %854 = vadd.xlane.f32.xlu1 %v853_v1  ;;  %v976_v1 = vsel %vm180_vm0, %v2150_v32, 0.0 }
 0x767   : > { %1011 = vadd.xlane.f32.xlu1 %v1010_v3 }
 0x768   : > { %1185 = vadd.xlane.f32.xlu0 %v1184_v9 }
 0x7a8   : > { %v872_v23 = vpop.xlane.xlu1 %871 }
 0x7a9   : > { %v873_v25 = vmul.f32 0.25, %v872_v23  ;;  %v1133_v23 = vsel %vm180_vm0, %v2187_v59, 0.0 }
 0x7ab   : > { %v2208_v27 = vsub.f32 %v2128_v2, %v873_v25  ;;  %v1290_v25 = vsel %vm180_vm0, %v2192_v8, 0.0 }
 0x7ac   : > { %v1343_v33 = vpop.xlane.xlu1 %1342  ;;  %v1029_v7 = vpop.xlane.xlu0 %1028 }
 0x7ad   : > { %v1344_v35 = vmul.f32 0.25, %v1343_v33  ;;  %v875_v24 = vmul.f32 %v2208_v27, %v2208_v27  ;;  %v1030_v45 = vmul.f32 0.25, %v1029_v7  ;;  %v2298_v33 = vld [vmem:[%s2490_s2] ss:$0 sm:$0xff] }
 0x7af   : > { %v2215_v39 = vsub.f32 %v2117_v58, %v1344_v35  ;;  %877 = vrot.lane.b32.xlu0 %v875_v24, %s1842_s29  ;;  %v2259_v48 = vsub.f32 %v2133_v18, %v1030_v45 }
 0x7b0   : > { %v256_v38 = vpop.permute.xlu0 %255 }
 0x7b1   : > { %v262_v37 = vsel %vm261_vm3, %v260_v5, %v256_v38  ;;  %v1346_v17 = vmul.f32 %v2215_v39, %v2215_v39 }
 0x7b2   : > { %1594 = vmatmul.mubr.msk.f32.vlgmr.msra.gmra.mrb[0].mxu0 %vm269_vm4, %v262_v37 }
 0x7b3   : > { %1348 = vrot.lane.b32.xlu0 %v1346_v17, %s1842_s29  ;;  %1653 = vmatpush3.bf16.msra.mxu0 %v2166_v46 }
 0x7b4   : > { %v422_v41 = vpop.permute.xlu0 %421  ;;  %1607 = vmatprep.mubr.msk.f32.mxu0 %vm1845_vm2, %v1846_v50  ;;  %1657 = vmatprep.subr.bf16.mxu0 %v1844_v22 }
 0x7b5   : > { %v426_v61 = vsel %vm261_vm3, %v425_v40, %v422_v41 }
 0x7b6   : > { %1601 = vmatmul.mubr.msk.f32.vlgmr.msra.gmra.mrb[0].mxu1 %vm269_vm4, %v426_v61 }
 0x7b7   : > { %1656 = vmatpush3.bf16.msra.mxu1 %v2166_v46  ;;  %1614 = vmatprep.mubr.msk.f32.mxu1 %vm1845_vm2, %v1846_v50 }
 0x7b8   : > { %v579_v42 = vpop.permute.xlu0 %578  ;;  %1660 = vmatprep.subr.bf16.mxu1 %v1844_v22 }
 0x7b9   : > { %v583_v63 = vsel %vm261_vm3, %v2086_v30, %v579_v42 }
 0x7ba   : > { %1608 = vmatmul.mubr.msk.f32.vlgmr.msra.gmra.mrb[2].mxu0 %vm269_vm4, %v583_v63 }
 0x7bb   : > { %1659 = vmatpush3.bf16.msra.mxu0 %v2166_v46  ;;  %1621 = vmatprep.mubr.msk.f32.mxu0 %vm1845_vm2, %v1846_v50 }
 0x7bc   : > { %v736_v49 = vpop.permute.xlu0 %735  ;;  %1663 = vmatprep.subr.bf16.mxu0 %v1844_v22 }
 0x7bd   : > { %v740_v43 = vsel %vm261_vm3, %v2125_v16, %v736_v49  ;;  %v1167_v16 = vsel %vm180_vm0, %v2138_v6, 0.0 }
 0x7be   : > { %1615 = vmatmul.mubr.msk.f32.vlgmr.msra.gmra.mrb[2].mxu1 %vm269_vm4, %v740_v43 }
 0x7bf   : > { %1662 = vmatpush3.bf16.msra.mxu1 %v2166_v46  ;;  %1628 = vmatprep.mubr.msk.f32.mxu1 %vm1845_vm2, %v1846_v50 }
 0x7c0   : > { %v1148_v30 = vpop.permute.xlu0 %1147  ;;  %1666 = vmatprep.subr.bf16.mxu1 %v1844_v22  ;;  %v1032_v22 = vmul.f32 %v2259_v48, %v2259_v48 }
 0x7c1   : > { %v1150_v21 = vsel %vm180_vm0, %v1148_v30, 0.0 }
 0x7c2   : > { %1151 = vadd.xlane.f32.xlu1 %v1150_v21 }
 0x7c4   : > { %v1305_v62 = vpop.permute.xlu0 %1304 }
 0x7c5   : > { %v1307_v44 = vsel %vm180_vm0, %v1305_v62, 0.0 }
 0x7c6   : > { %1308 = vadd.xlane.f32.xlu1 %v1307_v44 }
 0x7ca   : > { %1168 = vadd.xlane.f32.xlu1 %v1167_v16 }
 0x7ce   : > { %1325 = vadd.xlane.f32.xlu1 %v1324_v31 }
 0x7df   : > { %1034 = vrot.lane.b32.xlu1 %v1032_v22, %s1842_s29 }
 0x7ec   : > { %v995_v57 = vpop.xlane.xlu1 %994 }
 0x7ed   : > { %v996_v37 = vmul.f32 0.25, %v995_v57 }
 0x7ef   : > { %v2310_v61 = vsub.f32 %v2150_v32, %v996_v37 }
 0x7f0   : > { %v855_v0 = vpop.xlane.xlu1 %854 }
 0x7f1   : > { %v856_v29 = vmul.f32 0.25, %v855_v0  ;;  %v998_v43 = vmul.f32 %v2310_v61, %v2310_v61 }
 0x7f3   : > { %v857_v56 = vsub.f32 %v2128_v2, %v856_v29 }
 0x7f4   : > { %v1012_v9 = vpop.xlane.xlu1 %1011 }
 0x7f5   : > { %v1186_v13 = vpop.xlane.xlu0 %1185  ;;  %v858_v10 = vmul.f32 %v857_v56, %v857_v56 }
 0x7f6   : > { %v1187_v51 = vmul.f32 0.25, %v1186_v13 }
 0x7f7   : > { %v859_v3 = vsel %vm180_vm0, %v858_v10, 0.0 }
 0x7f8   : > { %v2265_v52 = vsub.f32 %v2138_v6, %v1187_v51 }
 0x7fa   : > { %v1189_v54 = vmul.f32 %v2265_v52, %v2265_v52 }
 0x7fc   : > { %1191 = vrot.lane.b32.xlu1 %v1189_v54, %s1842_s29  ;;  %v1013_v54 = vmul.f32 0.25, %v1012_v9 }
 0x7fe   : > { %v2332_v57 = vsub.f32 %v2133_v18, %v1013_v54 }
 0x800   : > { %843 = vrot.lane.b32.xlu1 %v841_v55, %s1842_s29  ;;  %v1015_v29 = vmul.f32 %v2332_v57, %v2332_v57 }
 0x802   : > { %v1016_v10 = vsel %vm180_vm0, %v1015_v29, 0.0 }
 0x821   : > { %v878_v12 = vpop.permute.xlu0 %877 }
 0x822   : > { %v880_v28 = vsel %vm180_vm0, %v878_v12, 0.0 }
 0x824   : > { %977 = vadd.xlane.f32.xlu1 %v976_v1 }
 0x825   : > { %v1349_v1 = vpop.permute.xlu0 %1348 }
 0x828   : > { %860 = vadd.xlane.f32.xlu1 %v859_v3  ;;  %v1351_v3 = vsel %vm180_vm0, %v1349_v1, 0.0 }
 0x84f   : > { %v2280_v34 = vpop.xlane.xlu1 %1151 }
 0x853   : > { %v1309_v11 = vpop.xlane.xlu1 %1308 }
 0x854   : > { %v1310_v31 = vmul.f32 0.25, %v1309_v11  ;;  %v828_v11 = vmul.f32 0.25, %v2196_v60 }
 0x856   : > { %v2322_v22 = vsub.f32 %v2192_v8, %v1310_v31 }
 0x857   : > { %v2282_v14 = vpop.xlane.xlu1 %1168 }
 0x858   : > { %v1312_v26 = vmul.f32 %v2322_v22, %v2322_v22 }
 0x85b   : > { %v1326_v15 = vpop.xlane.xlu1 %1325 }
 0x85c   : > { %v1327_v51 = vmul.f32 0.25, %v1326_v15  ;;  %v829_v15 = vadd.f32 1e-06, %v828_v11 }
 0x85e   : > { %v2329_v55 = vsub.f32 %v2117_v58, %v1327_v51  ;;  %v1153_v58 = vmul.f32 0.25, %v2280_v34 }
 0x85f   : > { %v1035_v4 = vpop.permute.xlu1 %1034 }
 0x860   : > { %v1037_v21 = vsel %vm180_vm0, %v1035_v4, 0.0  ;;  %v1329_v0 = vmul.f32 %v2329_v55, %v2329_v55  ;;  %v2343_v18 = vsub.f32 %v2187_v59, %v1153_v58 }
 0x862   : > { %v1155_v9 = vmul.f32 %v2343_v18, %v2343_v18 }
 0x86e   : > { %v2284_v19 = vpop.permute.xlu1 %1191 }
 0x872   : > { %v844_v2 = vpop.permute.xlu1 %843 }
 0x873   : > { %v846_v47 = vsel %vm180_vm0, %v844_v2, 0.0 }
 0x874   : > { %847 = vadd.xlane.f32.xlu0 %v846_v47 }
 0x878   : > { %1134 = vadd.xlane.f32.xlu0 %v1133_v23 }
 0x87c   : > { %1291 = vadd.xlane.f32.xlu0 %v1290_v25 }
 0x880   : > { %881 = vadd.xlane.f32.xlu0 %v880_v28 }
 0x885   : > { %v339_v7 = vpop.f32.mrb[0].mxu0 }
 0x886   : > { %v340_v35 = vadd.f32 %v2298_v33, %v339_v7  ;;  %v1595_v24 = vpop.f32.mrb[1].mxu0 }
 0x888   : > { %344 = vst.msk [vmem:[%s2301_s17] sm:$0xff] %vm343_vm5, %v340_v35 }
 0x889   : > { %v496_v36 = vpop.f32.mrb[0].mxu1 }
 0x88a   : > { %v497_v5 = vadd.f32 %v2298_v33, %v496_v36  ;;  %v1602_v38 = vpop.f32.mrb[1].mxu1  ;;  %v1170_v36 = vmul.f32 0.25, %v2282_v14 }
 0x88c   : > { %1533 = vst.msk [vmem:[%s2301_s17 + $0x8] sm:$0xff] %vm343_vm5, %v497_v5  ;;  %v2355_v38 = vsub.f32 %v2138_v6, %v1170_v36 }
 0x88d   : > { %v653_v17 = vpop.f32.mrb[2].mxu0 }
 0x88e   : > { %v654_v40 = vadd.f32 %v2298_v33, %v653_v17  ;;  %v1609_v41 = vpop.f32.mrb[3].mxu0  ;;  %v1172_v17 = vmul.f32 %v2355_v38, %v2355_v38 }
 0x890   : > { %1537 = vst.msk [vmem:[%s2301_s17 + $0x10] sm:$0xff] %vm343_vm5, %v654_v40 }
 0x891   : > { %v810_v42 = vpop.f32.mrb[2].mxu1 }
 0x892   : > { %v811_v63 = vadd.f32 %v2298_v33, %v810_v42  ;;  %v1616_v49 = vpop.f32.mrb[3].mxu1  ;;  %v1194_v42 = vsel %vm180_vm0, %v2284_v19, 0.0 }
 0x894   : > { %1541 = vst.msk [vmem:[%s2301_s17 + $0x18] sm:$0xff] %vm343_vm5, %v811_v63 }
 0x896   : > { %1000 = vrot.lane.b32.xlu0 %v998_v43, %s1842_s29 }
 0x8b1   : > { %v978_v30 = vpop.xlane.xlu1 %977 }
 0x8b2   : > { %v979_v37 = vmul.f32 0.25, %v978_v30 }
 0x8b4   : > { %v2360_v41 = vsub.f32 %v2150_v32, %v979_v37 }
 0x8b5   : > { %v861_v62 = vpop.xlane.xlu1 %860  ;;  %1038 = vadd.xlane.f32.xlu0 %v1037_v21 }
 0x8b6   : > { %v862_v44 = vmul.f32 0.25, %v861_v62  ;;  %v981_v6 = vmul.f32 %v2360_v41, %v2360_v41 }
 0x8b8   : > { %v863_v16 = vadd.f32 1e-06, %v862_v44  ;;  %v982_v49 = vsel %vm180_vm0, %v981_v6, 0.0 }
 0x8ba   : > { %1746 = vrsqrt.f32 %v863_v16 }
 0x8bb   : > { %1748 = vrsqrt.f32 %v829_v15 }
 0x8c4   : > { %v1747_v45 = vpop.eup %1746 }
 0x8c5   : > { %v865_v13 = vmul.f32 %v1747_v45, %v857_v56  ;;  %v1330_v56 = vsel %vm180_vm0, %v1329_v0, 0.0  ;;  %v1749_v34 = vpop.eup %1748 }
 0x8c6   : > { %v831_v35 = vmul.f32 %v1749_v34, %v2143_v20  ;;  %v1173_v20 = vsel %vm180_vm0, %v1172_v17, 0.0 }
 0x8c7   : > { %888 = vrot.lane.b32.xlu1 %v865_v13, %s1843_s30 }
 0x8cb   : > { %1314 = vrot.lane.b32.xlu0 %v1312_v26, %s1842_s29 }
 0x8ea   : > { %1331 = vadd.xlane.f32.xlu0 %v1330_v56 }
 0x8eb   : > { %1017 = vadd.xlane.f32.xlu1 %v1016_v10 }
 0x8ee   : > { %1352 = vadd.xlane.f32.xlu0 %v1351_v3 }
 0x8fc   : > { %1157 = vrot.lane.b32.xlu1 %v1155_v9, %s1842_s29  ;;  %s1782_s29 = sshll.u32 %s1847_s28, 4  ;;  %s1783_s29 = int_to_ptr.vmem [resolvable:$false] %s1782_s29 }
 0x8fd   : > { %s1784_s4 = scalar_lea.vmem %s1783_s29, 2048  ;;  %p1785_p0 = scmp.lt.s32.totalorder %s2440_s20, %s1783_s29 }
 0x8fe   : > { %p1786_p1 = scmp.lt.s32.totalorder %s1784_s4, %s1778_s27 }
 0x900   : > { %p1787_p2 = por %p1786_p1, %p1785_p0 }
 0x901   : > { %v848_v4 = vpop.xlane.xlu0 %847 }
 0x902   : > { %v849_v2 = vmul.f32 0.25, %v848_v4  ;;  %p1788_p3 = pnand %p1787_p2, %p1781_p13 }
 0x904   : > { %v850_v47 = vadd.f32 1e-06, %v849_v2 }
 0x905   : > { %v1135_v23 = vpop.xlane.xlu0 %1134 }
 0x906   : > { %1750 = vrsqrt.f32 %v850_v47  ;;  %v1136_v40 = vmul.f32 0.25, %v1135_v23 }
 0x909   : > { %v1292_v25 = vpop.xlane.xlu0 %1291 }
 0x90a   : > { %v1293_v14 = vmul.f32 0.25, %v1292_v25 }
 0x90c   : > { %v2371_v63 = vsub.f32 %v2192_v8, %v1293_v14 }
 0x90d   : > { %v882_v12 = vpop.xlane.xlu0 %881 }
 0x90e   : > { %v1295_v43 = vmul.f32 %v2371_v63, %v2371_v63  ;;  %v883_v30 = vmul.f32 0.25, %v882_v12 }
 0x910   : > { %v1751_v28 = vpop.eup %1750  ;;  %v1296_v19 = vsel %vm180_vm0, %v1295_v43, 0.0  ;;  %v884_v21 = vadd.f32 1e-06, %v883_v30 }
 0x911   : > { %v1001_v7 = vpop.permute.xlu0 %1000  ;;  %v852_v24 = vmul.f32 %v1751_v28, %v2268_v53  ;;  %v2364_v53 = vsub.f32 %v2187_v59, %v1136_v40 }
 0x912   : > { %v1003_v60 = vsel %vm180_vm0, %v1001_v7, 0.0  ;;  %1752 = vrsqrt.f32 %v884_v21 }
 0x913   : > { %1004 = vadd.xlane.f32.xlu0 %v1003_v60  ;;  %v895_v5 = vsel %vm180_vm0, %v831_v35, %v852_v24  ;;  %v1138_v32 = vmul.f32 %v2364_v53, %v2364_v53 }
 0x915   : > { %v1139_v59 = vsel %vm180_vm0, %v1138_v32, 0.0 }
 0x91c   : > { %v1753_v44 = vpop.eup %1752 }
 0x91d   : > { %v886_v16 = vmul.f32 %v1753_v44, %v2208_v27 }
 0x920   : > { %1174 = vadd.xlane.f32.xlu1 %v1173_v20 }
 0x924   : > { %1195 = vadd.xlane.f32.xlu1 %v1194_v42 }
 0x928   : > { %983 = vadd.xlane.f32.xlu1 %v982_v49 }
 0x92c   : > { %1140 = vadd.xlane.f32.xlu1 %v1139_v59 }
 0x930   : > { %1297 = vadd.xlane.f32.xlu1 %v1296_v19 }
 0x939   : > { %v889_v8 = vpop.permute.xlu1 %888 }
 0x93a   : > { %v896_v62 = vsel %vm259_vm1, %v895_v5, %v889_v8 }
 0x941   : > { %892 = vrot.lane.b32.xlu1 %v886_v16, %s1843_s30 }
 0x942   : > { %v1039_v31 = vpop.xlane.xlu0 %1038 }
 0x943   : > { %v1040_v45 = vmul.f32 0.25, %v1039_v31 }
 0x945   : > { %v1041_v13 = vadd.f32 1e-06, %v1040_v45 }
 0x946   : > { %v1315_v56 = vpop.permute.xlu0 %1314 }
 0x947   : > { %1754 = vrsqrt.f32 %v1041_v13  ;;  %v1317_v1 = vsel %vm180_vm0, %v1315_v56, 0.0 }
 0x951   : > { %v1755_v26 = vpop.eup %1754 }
 0x952   : > { %v1043_v51 = vmul.f32 %v1755_v26, %v2259_v48 }
 0x954   : > { %1049 = vrot.lane.b32.xlu1 %v1043_v51, %s1843_s30 }
 0x977   : > { %v1332_v48 = vpop.xlane.xlu0 %1331 }
 0x978   : > { %v1018_v54 = vpop.xlane.xlu1 %1017  ;;  %v1333_v9 = vmul.f32 0.25, %v1332_v48 }
 0x979   : > { %v1019_v27 = vmul.f32 0.25, %v1018_v54 }
 0x97a   : > { %v1334_v23 = vadd.f32 1e-06, %v1333_v9 }
 0x97b   : > { %v1020_v10 = vadd.f32 1e-06, %v1019_v27  ;;  %v1353_v11 = vpop.xlane.xlu0 %1352 }
 0x97c   : > { %v1158_v0 = vpop.permute.xlu1 %1157  ;;  %v1354_v2 = vmul.f32 0.25, %v1353_v11 }
 0x97d   : > { %v1160_v29 = vsel %vm180_vm0, %v1158_v0, 0.0  ;;  %1756 = vrsqrt.f32 %v1020_v10 }
 0x97e   : > { %1161 = vadd.xlane.f32.xlu0 %v1160_v29  ;;  %v1355_v34 = vadd.f32 1e-06, %v1354_v2 }
 0x982   : > { %1318 = vadd.xlane.f32.xlu0 %v1317_v1 }
 0x987   : > { %v1757_v3 = vpop.eup %1756 }
 0x988   : > { %v1022_v58 = vmul.f32 %v1757_v3, %v2332_v57 }
 0x998   : > { %1045 = vrot.lane.b32.xlu0 %v1022_v58, %s1843_s30 }
 0x9ad   : > { %v1175_v15 = vpop.xlane.xlu1 %1174 }
 0x9ae   : > { %v1176_v4 = vmul.f32 0.25, %v1175_v15 }
 0x9b0   : > { %v1177_v47 = vadd.f32 1e-06, %v1176_v4 }
 0x9b1   : > { %v1196_v25 = vpop.xlane.xlu1 %1195 }
 0x9b2   : > { %1758 = vrsqrt.f32 %v1177_v47  ;;  %v1197_v12 = vmul.f32 0.25, %v1196_v25 }
 0x9b3   : > { %1760 = vrsqrt.f32 %v1334_v23 }
 0x9b4   : > { %v1198_v28 = vadd.f32 1e-06, %v1197_v12 }
 0x9b5   : > { %v984_v7 = vpop.xlane.xlu1 %983 }
 0x9b6   : > { %1762 = vrsqrt.f32 %v1198_v28  ;;  %v985_v42 = vmul.f32 0.25, %v984_v7 }
 0x9b7   : > { %1764 = vrsqrt.f32 %v1355_v34 }
 0x9b8   : > { %v986_v32 = vadd.f32 1e-06, %v985_v42 }
 0x9b9   : > { %v1141_v57 = vpop.xlane.xlu1 %1140 }
 0x9ba   : > { %1766 = vrsqrt.f32 %v986_v32  ;;  %v1142_v45 = vmul.f32 0.25, %v1141_v57 }
 0x9bc   : > { %v1759_v35 = vpop.eup %1758 }
 0x9bd   : > { %v1298_v24 = vpop.xlane.xlu1 %1297  ;;  %v1179_v60 = vmul.f32 %v1759_v35, %v2355_v38  ;;  %v1761_v36 = vpop.eup %1760 }
 0x9be   : > { %v1336_v14 = vmul.f32 %v1761_v36, %v2329_v55  ;;  %v1299_v26 = vmul.f32 0.25, %v1298_v24 }
 0x9bf   : > { %1202 = vrot.lane.b32.xlu1 %v1179_v60, %s1843_s30 }
 0x9c0   : > { %v1763_v5 = vpop.eup %1762  ;;  %v1300_v54 = vadd.f32 1e-06, %v1299_v26 }
 0x9c1   : > { %v893_v37 = vpop.permute.xlu1 %892  ;;  %v1200_v17 = vmul.f32 %v1763_v5, %v2265_v52  ;;  %v1765_v40 = vpop.eup %1764 }
 0x9c2   : > { %v897_v20 = vsel %vm261_vm3, %v896_v62, %v893_v37  ;;  %v1357_v38 = vmul.f32 %v1765_v40, %v2215_v39  ;;  %v1005_v52 = vpop.xlane.xlu0 %1004 }
 0x9c3   : > { %1622 = vmatmul.mubr.msk.f32.vlgmr.msra.gmra.mrb[4].mxu0 %vm269_vm4, %v897_v20  ;;  %1206 = vrot.lane.b32.xlu0 %v1200_v17, %s1843_s30  ;;  %v1006_v6 = vmul.f32 0.25, %v1005_v52 }
 0x9c4   : > { %1359 = vrot.lane.b32.xlu1 %v1336_v14, %s1843_s30  ;;  %1665 = vmatpush3.bf16.msra.mxu0 %v2166_v46  ;;  %v1767_v59 = vpop.eup %1766 }
 0x9c5   : > { %1635 = vmatprep.mubr.msk.f32.mxu0 %vm1845_vm2, %v1846_v50  ;;  %v1007_v55 = vadd.f32 1e-06, %v1006_v6  ;;  %v988_v19 = vmul.f32 %v1767_v59, %v2360_v41 }
 0x9c6   : > { %v1050_v62 = vpop.permute.xlu1 %1049 }
 0x9c7   : > { %1363 = vrot.lane.b32.xlu0 %v1357_v38, %s1843_s30  ;;  %1768 = vrsqrt.f32 %v1007_v55 }
 0x9d1   : > { %v1769_v43 = vpop.eup %1768 }
 0x9d2   : > { %v1009_v39 = vmul.f32 %v1769_v43, %v2310_v61  ;;  %v1143_v61 = vadd.f32 1e-06, %v1142_v45 }
 0x9d4   : > { %v1052_v21 = vsel %vm180_vm0, %v988_v19, %v1009_v39 }
 0xa0b   : > { %v1162_v49 = vpop.xlane.xlu0 %1161 }
 0xa0c   : > { %v1163_v31 = vmul.f32 0.25, %v1162_v49 }
 0xa0e   : > { %v1164_v41 = vadd.f32 1e-06, %v1163_v31 }
 0xa0f   : > { %v1319_v30 = vpop.xlane.xlu0 %1318 }
 0xa10   : > { %v1320_v13 = vmul.f32 0.25, %v1319_v30  ;;  %1770 = vrsqrt.f32 %v1164_v41 }
 0xa11   : > { %1772 = vrsqrt.f32 %v1143_v61 }
 0xa12   : > { %v1321_v51 = vadd.f32 1e-06, %v1320_v13 }
 0xa13   : > { %v1046_v8 = vpop.permute.xlu0 %1045 }
 0xa14   : > { %v1053_v44 = vsel %vm259_vm1, %v1052_v21, %v1046_v8  ;;  %1774 = vrsqrt.f32 %v1321_v51 }
 0xa15   : > { %v1054_v16 = vsel %vm261_vm3, %v1053_v44, %v1050_v62  ;;  %1776 = vrsqrt.f32 %v1300_v54 }
 0xa16   : > { %1629 = vmatmul.mubr.msk.f32.vlgmr.msra.gmra.mrb[4].mxu1 %vm269_vm4, %v1054_v16 }
 0xa17   : > { %1668 = vmatpush3.bf16.msra.mxu1 %v2166_v46  ;;  %1642 = vmatprep.mubr.msk.f32.mxu1 %vm1845_vm2, %v1846_v50 }
 0xa1a   : > { %v1771_v0 = vpop.eup %1770 }
 0xa1b   : > { %v1773_v29 = vpop.eup %1772  ;;  %v1166_v56 = vmul.f32 %v1771_v0, %v2343_v18 }
 0xa1c   : > { %v1145_v50 = vmul.f32 %v1773_v29, %v2364_v53 }
 0xa1e   : > { %v1775_v46 = vpop.eup %1774  ;;  %v1209_v10 = vsel %vm180_vm0, %v1145_v50, %v1166_v56 }
 0xa1f   : > { %v1777_v27 = vpop.eup %1776  ;;  %v1323_v3 = vmul.f32 %v1775_v46, %v2322_v22 }
 0xa20   : > { %v1302_v9 = vmul.f32 %v1777_v27, %v2371_v63 }
 0xa22   : > { %v1366_v18 = vsel %vm180_vm0, %v1302_v9, %v1323_v3 }
 0xa31   : > { %v1203_v1 = vpop.permute.xlu1 %1202 }
 0xa32   : > { %v1210_v58 = vsel %vm259_vm1, %v1209_v10, %v1203_v1 }
 0xa35   : > { %v1207_v48 = vpop.permute.xlu0 %1206 }
 0xa36   : > { %v1360_v11 = vpop.permute.xlu1 %1359  ;;  %v1211_v15 = vsel %vm261_vm3, %v1210_v58, %v1207_v48 }
 0xa37   : > { %1636 = vmatmul.mubr.msk.f32.vlgmr.msra.gmra.mrb[6].mxu0 %vm269_vm4, %v1211_v15  ;;  %v1367_v53 = vsel %vm259_vm1, %v1366_v18, %v1360_v11 }
 0xa39   : > { %v1364_v4 = vpop.permute.xlu0 %1363 }
 0xa3a   : > { %v1368_v22 = vsel %vm261_vm3, %v1367_v53, %v1364_v4 }
 0xa3b   : > { %1643 = vmatmul.mubr.msk.f32.vlgmr.msra.gmra.mrb[6].mxu1 %vm269_vm4, %v1368_v22 }
 0xa96   : > { %v967_v2 = vpop.f32.mrb[4].mxu0 }
 0xa97   : > { %v968_v63 = vadd.f32 %v2298_v33, %v967_v2  ;;  %v1623_v47 = vpop.f32.mrb[5].mxu0 }
 0xa99   : > { %1545 = vst.msk [vmem:[%s2301_s17 + $0x20] sm:$0xff] %vm343_vm5, %v968_v63 }
 0xae9   : > { %v1124_v23 = vpop.f32.mrb[4].mxu1 }
 0xaea   : > { %v1125_v25 = vadd.f32 %v2298_v33, %v1124_v23  ;;  %v1630_v12 = vpop.f32.mrb[5].mxu1 }
 0xaec   : > { %1549 = vst.msk [vmem:[%s2301_s17 + $0x28] sm:$0xff] %vm343_vm5, %v1125_v25 }
 0xb0a   : > { %v1281_v34 = vpop.f32.mrb[6].mxu0 }
 0xb0b   : > { %v1282_v28 = vadd.f32 %v2298_v33, %v1281_v34  ;;  %v1637_v7 = vpop.f32.mrb[7].mxu0 }
 0xb0d   : > { %1553 = vst.msk [vmem:[%s2301_s17 + $0x30] sm:$0xff] %vm343_vm5, %v1282_v28 }
 0xb0e   : > { %v1438_v57 = vpop.f32.mrb[6].mxu1 }
 0xb0f   : > { %v1439_v35 = vadd.f32 %v2298_v33, %v1438_v57  ;;  %v1644_v24 = vpop.f32.mrb[7].mxu1 }
 0xb11   : > { %1557 = vst.msk [vmem:[%s2301_s17 + $0x38] sm:$0xff] %vm343_vm5, %v1439_v35 }
 0xb12   : > { %1791 = shalt.err (!%p1788_p3)
}
 0xb13   : > { %s1792_s5 = scalar_lea.hbm %s2437_s26, 1024  ;;  %s1796_s8 = scalar_lea.hbm %s2491_s3, 2048 }
 0xb14   : > { %p1793_p4 = scmp.ne.s32.totalorder %s2437_s26, %s1792_s5  ;;  %p1797_p9 = scmp.lt.u32.totalorder %s2437_s26, %s2491_s3 }
 0xb15   : > { %p1798_p10 = scmp.lt.u32.totalorder %s1796_s8, %s1792_s5  ;;  %p1800_p12 = scmp.lt.u32.totalorder %s1792_s5, %s2437_s26 }
 0xb16   : > { %p1794_p7 = pnand %p1793_p4, %p1907_p5 }
 0xb17   : > { %p1799_p11 = por %p1798_p10, %p1797_p9 }
 0xb18   : > { %p1795_p8 = pneg %p1794_p7 }
 0xb19   : > { %p1801_p13 = por %p1800_p12, %p1799_p11 }
 0xb1b   : > { %p1802_p0 = pnand %p1801_p13, %p1795_p8 }
 0xb1d   : > { %1805 = shalt.err (!%p1802_p0)
}
 0xb1e   : > { %s1848_s11 = smov 128  }
 0xb1f   : > { %1669 = dma.vmem_to_hbm [thread:$0]  (%p1907_p5), %s2440_s20, 1024, %s2437_s26, %s2446_s16, %s1848_s11, %s1848_s11, %s1843_s30  }
 0xb20 PF: > { %p1675_p1 = scmp.ge.s32.totalorder %s1840_s15, 2  ;;  %s1473_s17 = sand.u32 1, %s1828_s12  }
 0xb21   : > { %s1474_s19 = scalar_lea.sflag [#allocation3], %s1473_s17 }
 0xb22   : > { %p1672_p2 = pnand %p1675_p1, %p1911_p6 }
 0xb24   : > { %1823 = dma.done.wait (!%p1672_p2), %s1474_s19, 1024  }
 0xb25   : > { %1825 = vsyncadd (!%p1672_p2), %s1474_s19, 4294966272  ;;  %p13_p3 = scmp.ge.s32.totalorder %s1894_s18, 4   ;;  %s2494_s12 = smov %s1832_s13 }
 0xb26   : > { %s2495_s13 = smov %s1836_s14  ;;  %s2496_s14 = smov %s1905_s21 }
 0xb27   : > { %s2497_s15 = smov %s1894_s18  ;;  %15 = sbr.rel (!%p13_p3) target bundleno = 3 (0x3), region = 81 }
 0xb2e   :  { %1479 = vsyncpa [#allocation3], 1 }
 0xb2f   :  { %1481 = vsyncpa [#allocation3 + $0x1], 1 }

</bundles_post_ra>
